<compile_context>
chip_gen: v5e
topology: v5e:2x2
jax: 0.10.0
libtpu: 0.0.40
codegen_flags: <defaults>
</compile_context>

<pallas_src>
import functools

import jax
import jax.numpy as jnp
from jax.experimental import pallas as pl
from jax.experimental.pallas import tpu as pltpu

BN_EPS = 1e-5


def _round_up(v, m):
    return (v + m - 1) // m * m


def encoder_kernel(x_ref, ai_ref, pool_ref, mask_ref, counts_ref,
                   w0_ref, b0_ref, w1_ref, b1_ref,
                   gwa_ref, gba_ref, gwb_ref, gbb_ref,
                   gamma_ref, beta_ref,
                   lconv_w_ref, lconv_b_ref,
                   out_ref, *, inv_n):
    f32 = jnp.float32
    bf16 = jnp.bfloat16

    # --- ini_embed: Linear -> ReLU -> Linear (bf16 operands pre-cast in wrapper) ---
    h = jnp.dot(x_ref[...], w0_ref[...], preferred_element_type=f32) + b0_ref[...]
    h = jnp.maximum(h, 0.0)
    x = jnp.dot(h.astype(bf16), w1_ref[...], preferred_element_type=f32) + b1_ref[...]

    num_layers = gwa_ref.shape[0]

    ai = ai_ref[...]            # bf16 [N, N] : adjacency + identity
    mask_col = mask_ref[...]    # f32  [N, 1] : 1 for real nodes, 0 for padding

    # layer_conv folded: acc = sum_l lconv_w[l] * x_l   (f32 VPU axpy)
    acc_nd = jnp.zeros(x.shape, f32)

    for l in range(num_layers):  # static unroll over GIN layers (L is small)
        xb = x.astype(bf16)      # cast once, reused by the neighborhood matmul
        # GINConv (eps=0): mlp((1+eps)*x + sum_{j in N(i)} x_j) == mlp((A+I) @ x)
        z = jnp.dot(ai, xb, preferred_element_type=f32)
        h1 = jnp.dot(z.astype(bf16), gwa_ref[l], preferred_element_type=f32) + gba_ref[l]
        h1 = jnp.maximum(h1, 0.0)
        h2 = jnp.dot(h1.astype(bf16), gwb_ref[l], preferred_element_type=f32) + gbb_ref[l]
        # outer F.relu from the Encoder forward
        h3 = jnp.maximum(h2, 0.0)
        # BatchNorm1d (training mode, biased variance): masked f32 stats on the
        # VPU/XLU (MXU is the saturating unit); two-pass form avoids
        # E[x^2] - E[x]^2 cancellation. Padded node rows are masked out.
        mean = jnp.sum(h3 * mask_col, axis=0, keepdims=True) * inv_n      # [1, D]
        diff = (h3 - mean) * mask_col
        var = jnp.sum(diff * diff, axis=0, keepdims=True) * inv_n         # [1, D]
        x = (h3 - mean) * jax.lax.rsqrt(var + BN_EPS) * gamma_ref[l] + beta_ref[l]
        # layer_conv (Conv2d(L,1,(1,1))): weighted sum over layers, f32 axpy.
        acc_nd = acc_nd + lconv_w_ref[l] * x

    # global_add_pool: single [G, N] @ [N, D] MXU matmul after the loop.
    pooled = jnp.dot(pool_ref[...], acc_nd.astype(bf16), preferred_element_type=f32)
    # layer_conv bias contributes lconv_b * nodes_per_graph after sum pooling.
    out_ref[...] = pooled + lconv_b_ref[0] * counts_ref[...]


def encoder_forward(x, edge_index, batch, num_graphs, params):
    n, f = x.shape
    dim = params["w1"].shape[1]
    num_layers = int(params["gwa"].shape[0])

    # bf16 operands pack 16 rows per sublane; for small/moderate N pad all the
    # way to 128 so A / pool lanes feeding the MXU contraction are dense.
    n_pad = _round_up(n, 128) if n <= 2048 else _round_up(n, 16)
    f_pad = _round_up(f, 128)     # lane alignment for input features
    d_pad = _round_up(dim, 128)   # lane alignment for hidden dim (lane-dense out)
    g_pad = _round_up(num_graphs, 8)

    f32 = jnp.float32
    bf16 = jnp.bfloat16

    # --- glue (plain JAX): dense adjacency (+ identity), pooling matrix ---
    adj = jnp.zeros((n_pad, n_pad), f32).at[edge_index[1], edge_index[0]].add(1.0)
    # NOTE: integer edge multiplicities <= 256 are exact in bf16.
    adj = (adj + jnp.eye(n_pad, dtype=f32)).astype(bf16)
    pool = (batch[None, :] == jnp.arange(num_graphs)[:, None]).astype(f32)   # [G, n]
    pool = jnp.pad(pool, ((0, g_pad - num_graphs), (0, n_pad - n)))
    counts = jnp.sum(pool, axis=1, keepdims=True)          # [G_pad, 1] nodes per graph
    pool = pool.astype(bf16)
    mask_col = (jnp.arange(n_pad) < n).astype(f32)[:, None]  # [n_pad, 1]

    x_p = jnp.pad(x.astype(f32), ((0, n_pad - n), (0, f_pad - f))).astype(bf16)

    def pad2(w, r, c, dt):
        return jnp.pad(w.astype(f32),
                       ((0, r - w.shape[0]), (0, c - w.shape[1]))).astype(dt)

    def pad3(w, r, c, dt):
        return jnp.pad(w.astype(f32),
                       ((0, 0), (0, r - w.shape[1]), (0, c - w.shape[2]))).astype(dt)

    # Matmul weights pre-cast to bf16 in the wrapper (halves weight DMA bytes,
    # removes in-kernel VPU casts); biases / BN affine params stay f32.
    w0 = pad2(params["w0"], f_pad, d_pad, bf16)
    b0 = pad2(params["b0"], 1, d_pad, f32)
    w1 = pad2(params["w1"], d_pad, d_pad, bf16)
    b1 = pad2(params["b1"], 1, d_pad, f32)
    gwa = pad3(params["gwa"], d_pad, d_pad, bf16)
    gba = pad3(params["gba"], 1, d_pad, f32)
    gwb = pad3(params["gwb"], d_pad, d_pad, bf16)
    gbb = pad3(params["gbb"], 1, d_pad, f32)
    gamma = pad3(params["gamma"], 1, d_pad, f32)
    beta = pad3(params["beta"], 1, d_pad, f32)
    lconv_w = params["lconv_w"].astype(f32)
    lconv_b = params["lconv_b"].astype(f32)

    operands = [x_p, adj, pool, mask_col, counts,
                w0, b0, w1, b1, gwa, gba, gwb, gbb, gamma, beta]

    # --- compiler hints: VMEM budget (capped by device VMEM; v7x = 64 MiB/TC) ---
    in_bytes = sum(int(op.size) * op.dtype.itemsize for op in operands)
    in_bytes += int(lconv_w.size) * 4 + int(lconv_b.size) * 4
    out_bytes = g_pad * d_pad * 4
    act_bytes = 8 * n_pad * d_pad * 4          # live activations inside the kernel
    try:
        vmem_cap = int(pltpu.get_tpu_info().vmem_capacity_bytes)
    except Exception:
        vmem_cap = 64 * 1024 * 1024            # conservative v7x per-TC floor
    vmem_limit = int(min(vmem_cap * 3 // 4,
                         max(16 * 1024 * 1024,
                             2 * (in_bytes + out_bytes + act_bytes))))

    flops = 2 * n_pad * f_pad * d_pad + 2 * n_pad * d_pad * d_pad       # ini_embed
    flops += num_layers * (2 * n_pad * n_pad * d_pad                    # (A+I) @ x
                           + 4 * n_pad * d_pad * d_pad)                 # GIN MLP
    flops += 2 * g_pad * n_pad * d_pad                                  # single pool matmul
    cost = pl.CostEstimate(flops=flops,
                           transcendentals=num_layers * d_pad,
                           bytes_accessed=in_bytes + out_bytes)

    vmem = pl.BlockSpec(memory_space=pltpu.MemorySpace.VMEM)
    smem = pl.BlockSpec(memory_space=pltpu.MemorySpace.SMEM)

    out = pl.pallas_call(
        functools.partial(encoder_kernel, inv_n=1.0 / n),
        out_shape=jax.ShapeDtypeStruct((g_pad, d_pad), jnp.float32),
        in_specs=[vmem] * 15 + [smem, smem],
        out_specs=vmem,
        compiler_params=pltpu.CompilerParams(vmem_limit_bytes=vmem_limit),
        cost_estimate=cost,
    )(*operands, lconv_w, lconv_b)

    return out[:num_graphs, :dim]


def encoder_reference(x, edge_index, batch, num_graphs, params):
    """Pure-JAX f32 reference (mirrors the PyTorch forward) for validation."""
    n = x.shape[0]
    adj = jnp.zeros((n, n), jnp.float32).at[edge_index[1], edge_index[0]].add(1.0)
    x = x.astype(jnp.float32)
    h = jnp.maximum(x @ params["w0"] + params["b0"], 0.0)
    x = h @ params["w1"] + params["b1"]
    layer_out = []
    for l in range(params["gwa"].shape[0]):
        z = x + adj @ x
        h1 = jnp.maximum(z @ params["gwa"][l] + params["gba"][l], 0.0)
        h2 = h1 @ params["gwb"][l] + params["gbb"][l]
        h3 = jnp.maximum(h2, 0.0)
        mean = h3.mean(axis=0, keepdims=True)
        var = ((h3 - mean) ** 2).mean(axis=0, keepdims=True)
        x = (h3 - mean) / jnp.sqrt(var + BN_EPS) * params["gamma"][l] + params["beta"][l]
        layer_out.append(x)
    stacked = jnp.stack(layer_out, axis=0)                    # [L, N, D]
    pos = jnp.einsum("l,lnd->nd", params["lconv_w"], stacked) + params["lconv_b"][0]
    pool = (batch[None, :] == jnp.arange(num_graphs)[:, None]).astype(jnp.float32)
    return pool @ pos


def make_params(key, num_features, dim, num_gc_layers):
    keys = jax.random.split(key, 16)
    s = 0.1

    def rnd(k, shape):
        return (s * jax.random.normal(k, shape)).astype(jnp.float32)

    return {
        # ini_embed
        "w0": rnd(keys[0], (num_features, dim)),
        "b0": rnd(keys[1], (1, dim)),
        "w1": rnd(keys[2], (dim, dim)),
        "b1": rnd(keys[3], (1, dim)),
        # GIN layer MLPs (stacked over layers)
        "gwa": rnd(keys[4], (num_gc_layers, dim, dim)),
        "gba": rnd(keys[5], (num_gc_layers, 1, dim)),
        "gwb": rnd(keys[6], (num_gc_layers, dim, dim)),
        "gbb": rnd(keys[7], (num_gc_layers, 1, dim)),
        # BatchNorm1d affine params
        "gamma": (1.0 + rnd(keys[8], (num_gc_layers, 1, dim))).astype(jnp.float32),
        "beta": rnd(keys[9], (num_gc_layers, 1, dim)),
        # layer_conv = Conv2d(num_gc_layers, 1, (1,1)): weight [L], bias [1]
        "lconv_w": rnd(keys[10], (num_gc_layers,)),
        "lconv_b": rnd(keys[11], (1,)),
    }


if __name__ == "__main__":
    # Small shapes consistent with the module.
    num_features = 8
    dim = 32
    num_gc_layers = 3
    n_nodes = 16
    n_edges = 40
    num_graphs = 2

    key = jax.random.PRNGKey(0)
    k_x, k_e, k_p = jax.random.split(key, 3)

    x = jax.random.normal(k_x, (n_nodes, num_features), dtype=jnp.float32)
    edge_index = jax.random.randint(k_e, (2, n_edges), 0, n_nodes, dtype=jnp.int32)
    # batch: first 9 nodes -> graph 0, remaining 7 -> graph 1 (sorted, like PyG)
    batch = jnp.concatenate([jnp.zeros((9,), jnp.int32), jnp.ones((7,), jnp.int32)])

    params = make_params(k_p, num_features, dim, num_gc_layers)

    out = encoder_forward(x, edge_index, batch, num_graphs, params)
    out = jax.block_until_ready(out)

    ref = encoder_reference(x, edge_index, batch, num_graphs, params)
    assert out.shape == (num_graphs, dim)
    # bf16 MXU operands (f32 accumulation) -> looser tolerance than pure f32.
    assert jnp.allclose(out, ref, atol=5e-2, rtol=5e-2), (out, ref)

    print("KERNEL_OK")
</pallas_src>

<mosaic_0001>
module attributes {stable_mosaic.version = 11 : i64} {
  func.func @encoder_kernel(%arg0: memref<128x128xbf16, #tpu.memory_space<vmem>>, %arg1: memref<128x128xbf16, #tpu.memory_space<vmem>>, %arg2: memref<8x128xbf16, #tpu.memory_space<vmem>>, %arg3: memref<128x1xf32, #tpu.memory_space<vmem>>, %arg4: memref<8x1xf32, #tpu.memory_space<vmem>>, %arg5: memref<128x128xbf16, #tpu.memory_space<vmem>>, %arg6: memref<1x128xf32, #tpu.memory_space<vmem>>, %arg7: memref<128x128xbf16, #tpu.memory_space<vmem>>, %arg8: memref<1x128xf32, #tpu.memory_space<vmem>>, %arg9: memref<3x128x128xbf16, #tpu.memory_space<vmem>>, %arg10: memref<3x1x128xf32, #tpu.memory_space<vmem>>, %arg11: memref<3x128x128xbf16, #tpu.memory_space<vmem>>, %arg12: memref<3x1x128xf32, #tpu.memory_space<vmem>>, %arg13: memref<3x1x128xf32, #tpu.memory_space<vmem>>, %arg14: memref<3x1x128xf32, #tpu.memory_space<vmem>>, %arg15: memref<3xf32, #tpu.memory_space<smem>>, %arg16: memref<1xf32, #tpu.memory_space<smem>>, %arg17: memref<8x128xf32, #tpu.memory_space<vmem>>) attributes {dimension_semantics = [], scalar_prefetch = 0 : i64, scratch_operands = 0 : i64, tpu.core_type = #tpu.core_type<tc>} {
    %c0 = arith.constant 0 : index
    %c0_0 = arith.constant 0 : index
    %0 = vector.load %arg0[%c0, %c0_0] : memref<128x128xbf16, #tpu.memory_space<vmem>>, vector<128x128xbf16>
    %c0_1 = arith.constant 0 : index
    %c0_2 = arith.constant 0 : index
    %1 = vector.load %arg5[%c0_1, %c0_2] : memref<128x128xbf16, #tpu.memory_space<vmem>>, vector<128x128xbf16>
    %cst = arith.constant dense<0.000000e+00> : vector<128x128xf32>
    %2 = tpu.matmul %0, %1, %cst {dimension_numbers = #tpu.dot_dimension_numbers<[1], [0], [0], [1], [0, 0, 1, 1], [], []>} : vector<128x128xbf16>, vector<128x128xbf16>, vector<128x128xf32> -> vector<128x128xf32>
    %c0_3 = arith.constant 0 : index
    %c0_4 = arith.constant 0 : index
    %3 = vector.load %arg6[%c0_3, %c0_4] : memref<1x128xf32, #tpu.memory_space<vmem>>, vector<1x128xf32>
    %4 = vector.broadcast %3 : vector<1x128xf32> to vector<128x128xf32>
    %5 = arith.addf %2, %4 : vector<128x128xf32>
    %cst_5 = arith.constant 0.000000e+00 : f32
    %6 = vector.broadcast %cst_5 : f32 to vector<128x128xf32>
    %7 = arith.maximumf %5, %6 : vector<128x128xf32>
    %8 = arith.truncf %7 : vector<128x128xf32> to vector<128x128xbf16>
    %c0_6 = arith.constant 0 : index
    %c0_7 = arith.constant 0 : index
    %9 = vector.load %arg7[%c0_6, %c0_7] : memref<128x128xbf16, #tpu.memory_space<vmem>>, vector<128x128xbf16>
    %cst_8 = arith.constant dense<0.000000e+00> : vector<128x128xf32>
    %10 = tpu.matmul %8, %9, %cst_8 {dimension_numbers = #tpu.dot_dimension_numbers<[1], [0], [0], [1], [0, 0, 1, 1], [], []>} : vector<128x128xbf16>, vector<128x128xbf16>, vector<128x128xf32> -> vector<128x128xf32>
    %c0_9 = arith.constant 0 : index
    %c0_10 = arith.constant 0 : index
    %11 = vector.load %arg8[%c0_9, %c0_10] : memref<1x128xf32, #tpu.memory_space<vmem>>, vector<1x128xf32>
    %12 = vector.broadcast %11 : vector<1x128xf32> to vector<128x128xf32>
    %13 = arith.addf %10, %12 : vector<128x128xf32>
    %c0_11 = arith.constant 0 : index
    %c0_12 = arith.constant 0 : index
    %14 = vector.load %arg1[%c0_11, %c0_12] : memref<128x128xbf16, #tpu.memory_space<vmem>>, vector<128x128xbf16>
    %c0_13 = arith.constant 0 : index
    %c0_14 = arith.constant 0 : index
    %15 = vector.load %arg3[%c0_13, %c0_14] : memref<128x1xf32, #tpu.memory_space<vmem>>, vector<128x1xf32>
    %cst_15 = arith.constant 0.000000e+00 : f32
    %16 = vector.broadcast %cst_15 : f32 to vector<128x128xf32>
    %17 = arith.truncf %13 : vector<128x128xf32> to vector<128x128xbf16>
    %cst_16 = arith.constant dense<0.000000e+00> : vector<128x128xf32>
    %18 = tpu.matmul %14, %17, %cst_16 {dimension_numbers = #tpu.dot_dimension_numbers<[1], [0], [0], [1], [0, 0, 1, 1], [], []>} : vector<128x128xbf16>, vector<128x128xbf16>, vector<128x128xf32> -> vector<128x128xf32>
    %19 = arith.truncf %18 : vector<128x128xf32> to vector<128x128xbf16>
    %c0_17 = arith.constant 0 : index
    %c0_18 = arith.constant 0 : index
    %c0_19 = arith.constant 0 : index
    %20 = vector.load %arg9[%c0_17, %c0_18, %c0_19] : memref<3x128x128xbf16, #tpu.memory_space<vmem>>, vector<1x128x128xbf16>
    %21 = vector.shape_cast %20 : vector<1x128x128xbf16> to vector<128x128xbf16>
    %cst_20 = arith.constant dense<0.000000e+00> : vector<128x128xf32>
    %22 = tpu.matmul %19, %21, %cst_20 {dimension_numbers = #tpu.dot_dimension_numbers<[1], [0], [0], [1], [0, 0, 1, 1], [], []>} : vector<128x128xbf16>, vector<128x128xbf16>, vector<128x128xf32> -> vector<128x128xf32>
    %c0_21 = arith.constant 0 : index
    %c0_22 = arith.constant 0 : index
    %c0_23 = arith.constant 0 : index
    %23 = vector.load %arg10[%c0_21, %c0_22, %c0_23] : memref<3x1x128xf32, #tpu.memory_space<vmem>>, vector<1x1x128xf32>
    %24 = vector.shape_cast %23 : vector<1x1x128xf32> to vector<1x128xf32>
    %25 = vector.broadcast %24 : vector<1x128xf32> to vector<128x128xf32>
    %26 = arith.addf %22, %25 : vector<128x128xf32>
    %cst_24 = arith.constant 0.000000e+00 : f32
    %27 = vector.broadcast %cst_24 : f32 to vector<128x128xf32>
    %28 = arith.maximumf %26, %27 : vector<128x128xf32>
    %29 = arith.truncf %28 : vector<128x128xf32> to vector<128x128xbf16>
    %c0_25 = arith.constant 0 : index
    %c0_26 = arith.constant 0 : index
    %c0_27 = arith.constant 0 : index
    %30 = vector.load %arg11[%c0_25, %c0_26, %c0_27] : memref<3x128x128xbf16, #tpu.memory_space<vmem>>, vector<1x128x128xbf16>
    %31 = vector.shape_cast %30 : vector<1x128x128xbf16> to vector<128x128xbf16>
    %cst_28 = arith.constant dense<0.000000e+00> : vector<128x128xf32>
    %32 = tpu.matmul %29, %31, %cst_28 {dimension_numbers = #tpu.dot_dimension_numbers<[1], [0], [0], [1], [0, 0, 1, 1], [], []>} : vector<128x128xbf16>, vector<128x128xbf16>, vector<128x128xf32> -> vector<128x128xf32>
    %c0_29 = arith.constant 0 : index
    %c0_30 = arith.constant 0 : index
    %c0_31 = arith.constant 0 : index
    %33 = vector.load %arg12[%c0_29, %c0_30, %c0_31] : memref<3x1x128xf32, #tpu.memory_space<vmem>>, vector<1x1x128xf32>
    %34 = vector.shape_cast %33 : vector<1x1x128xf32> to vector<1x128xf32>
    %35 = vector.broadcast %34 : vector<1x128xf32> to vector<128x128xf32>
    %36 = arith.addf %32, %35 : vector<128x128xf32>
    %cst_32 = arith.constant 0.000000e+00 : f32
    %37 = vector.broadcast %cst_32 : f32 to vector<128x128xf32>
    %38 = arith.maximumf %36, %37 : vector<128x128xf32>
    %39 = vector.broadcast %15 : vector<128x1xf32> to vector<128x128xf32>
    %40 = arith.mulf %38, %39 : vector<128x128xf32>
    %cst_33 = arith.constant dense<0.000000e+00> : vector<128xf32>
    %41 = vector.multi_reduction <add>, %40, %cst_33 [0] : vector<128x128xf32> to vector<128xf32>
    %42 = vector.shape_cast %41 : vector<128xf32> to vector<1x128xf32>
    %cst_34 = arith.constant 6.250000e-02 : f32
    %43 = vector.broadcast %cst_34 : f32 to vector<1x128xf32>
    %44 = arith.mulf %42, %43 : vector<1x128xf32>
    %45 = vector.broadcast %44 : vector<1x128xf32> to vector<128x128xf32>
    %46 = arith.subf %38, %45 : vector<128x128xf32>
    %47 = vector.broadcast %15 : vector<128x1xf32> to vector<128x128xf32>
    %48 = arith.mulf %46, %47 : vector<128x128xf32>
    %49 = arith.mulf %48, %48 : vector<128x128xf32>
    %cst_35 = arith.constant dense<0.000000e+00> : vector<128xf32>
    %50 = vector.multi_reduction <add>, %49, %cst_35 [0] : vector<128x128xf32> to vector<128xf32>
    %51 = vector.shape_cast %50 : vector<128xf32> to vector<1x128xf32>
    %cst_36 = arith.constant 6.250000e-02 : f32
    %52 = vector.broadcast %cst_36 : f32 to vector<1x128xf32>
    %53 = arith.mulf %51, %52 : vector<1x128xf32>
    %54 = vector.broadcast %44 : vector<1x128xf32> to vector<128x128xf32>
    %55 = arith.subf %38, %54 : vector<128x128xf32>
    %cst_37 = arith.constant 9.99999974E-6 : f32
    %56 = vector.broadcast %cst_37 : f32 to vector<1x128xf32>
    %57 = arith.addf %53, %56 : vector<1x128xf32>
    %58 = math.rsqrt %57 : vector<1x128xf32>
    %59 = vector.broadcast %58 : vector<1x128xf32> to vector<128x128xf32>
    %60 = arith.mulf %55, %59 : vector<128x128xf32>
    %c0_38 = arith.constant 0 : index
    %c0_39 = arith.constant 0 : index
    %c0_40 = arith.constant 0 : index
    %61 = vector.load %arg13[%c0_38, %c0_39, %c0_40] : memref<3x1x128xf32, #tpu.memory_space<vmem>>, vector<1x1x128xf32>
    %62 = vector.shape_cast %61 : vector<1x1x128xf32> to vector<1x128xf32>
    %63 = vector.broadcast %62 : vector<1x128xf32> to vector<128x128xf32>
    %64 = arith.mulf %60, %63 : vector<128x128xf32>
    %c0_41 = arith.constant 0 : index
    %c0_42 = arith.constant 0 : index
    %c0_43 = arith.constant 0 : index
    %65 = vector.load %arg14[%c0_41, %c0_42, %c0_43] : memref<3x1x128xf32, #tpu.memory_space<vmem>>, vector<1x1x128xf32>
    %66 = vector.shape_cast %65 : vector<1x1x128xf32> to vector<1x128xf32>
    %67 = vector.broadcast %66 : vector<1x128xf32> to vector<128x128xf32>
    %68 = arith.addf %64, %67 : vector<128x128xf32>
    %c0_44 = arith.constant 0 : index
    %69 = memref.load %arg15[%c0_44] : memref<3xf32, #tpu.memory_space<smem>>
    %70 = vector.broadcast %69 : f32 to vector<128x128xf32>
    %71 = arith.mulf %70, %68 : vector<128x128xf32>
    %72 = arith.addf %16, %71 : vector<128x128xf32>
    %73 = arith.truncf %68 : vector<128x128xf32> to vector<128x128xbf16>
    %cst_45 = arith.constant dense<0.000000e+00> : vector<128x128xf32>
    %74 = tpu.matmul %14, %73, %cst_45 {dimension_numbers = #tpu.dot_dimension_numbers<[1], [0], [0], [1], [0, 0, 1, 1], [], []>} : vector<128x128xbf16>, vector<128x128xbf16>, vector<128x128xf32> -> vector<128x128xf32>
    %75 = arith.truncf %74 : vector<128x128xf32> to vector<128x128xbf16>
    %c1 = arith.constant 1 : index
    %c0_46 = arith.constant 0 : index
    %c0_47 = arith.constant 0 : index
    %76 = vector.load %arg9[%c1, %c0_46, %c0_47] : memref<3x128x128xbf16, #tpu.memory_space<vmem>>, vector<1x128x128xbf16>
    %77 = vector.shape_cast %76 : vector<1x128x128xbf16> to vector<128x128xbf16>
    %cst_48 = arith.constant dense<0.000000e+00> : vector<128x128xf32>
    %78 = tpu.matmul %75, %77, %cst_48 {dimension_numbers = #tpu.dot_dimension_numbers<[1], [0], [0], [1], [0, 0, 1, 1], [], []>} : vector<128x128xbf16>, vector<128x128xbf16>, vector<128x128xf32> -> vector<128x128xf32>
    %c1_49 = arith.constant 1 : index
    %c0_50 = arith.constant 0 : index
    %c0_51 = arith.constant 0 : index
    %79 = vector.load %arg10[%c1_49, %c0_50, %c0_51] : memref<3x1x128xf32, #tpu.memory_space<vmem>>, vector<1x1x128xf32>
    %80 = vector.shape_cast %79 : vector<1x1x128xf32> to vector<1x128xf32>
    %81 = vector.broadcast %80 : vector<1x128xf32> to vector<128x128xf32>
    %82 = arith.addf %78, %81 : vector<128x128xf32>
    %cst_52 = arith.constant 0.000000e+00 : f32
    %83 = vector.broadcast %cst_52 : f32 to vector<128x128xf32>
    %84 = arith.maximumf %82, %83 : vector<128x128xf32>
    %85 = arith.truncf %84 : vector<128x128xf32> to vector<128x128xbf16>
    %c1_53 = arith.constant 1 : index
    %c0_54 = arith.constant 0 : index
    %c0_55 = arith.constant 0 : index
    %86 = vector.load %arg11[%c1_53, %c0_54, %c0_55] : memref<3x128x128xbf16, #tpu.memory_space<vmem>>, vector<1x128x128xbf16>
    %87 = vector.shape_cast %86 : vector<1x128x128xbf16> to vector<128x128xbf16>
    %cst_56 = arith.constant dense<0.000000e+00> : vector<128x128xf32>
    %88 = tpu.matmul %85, %87, %cst_56 {dimension_numbers = #tpu.dot_dimension_numbers<[1], [0], [0], [1], [0, 0, 1, 1], [], []>} : vector<128x128xbf16>, vector<128x128xbf16>, vector<128x128xf32> -> vector<128x128xf32>
    %c1_57 = arith.constant 1 : index
    %c0_58 = arith.constant 0 : index
    %c0_59 = arith.constant 0 : index
    %89 = vector.load %arg12[%c1_57, %c0_58, %c0_59] : memref<3x1x128xf32, #tpu.memory_space<vmem>>, vector<1x1x128xf32>
    %90 = vector.shape_cast %89 : vector<1x1x128xf32> to vector<1x128xf32>
    %91 = vector.broadcast %90 : vector<1x128xf32> to vector<128x128xf32>
    %92 = arith.addf %88, %91 : vector<128x128xf32>
    %cst_60 = arith.constant 0.000000e+00 : f32
    %93 = vector.broadcast %cst_60 : f32 to vector<128x128xf32>
    %94 = arith.maximumf %92, %93 : vector<128x128xf32>
    %95 = vector.broadcast %15 : vector<128x1xf32> to vector<128x128xf32>
    %96 = arith.mulf %94, %95 : vector<128x128xf32>
    %cst_61 = arith.constant dense<0.000000e+00> : vector<128xf32>
    %97 = vector.multi_reduction <add>, %96, %cst_61 [0] : vector<128x128xf32> to vector<128xf32>
    %98 = vector.shape_cast %97 : vector<128xf32> to vector<1x128xf32>
    %cst_62 = arith.constant 6.250000e-02 : f32
    %99 = vector.broadcast %cst_62 : f32 to vector<1x128xf32>
    %100 = arith.mulf %98, %99 : vector<1x128xf32>
    %101 = vector.broadcast %100 : vector<1x128xf32> to vector<128x128xf32>
    %102 = arith.subf %94, %101 : vector<128x128xf32>
    %103 = vector.broadcast %15 : vector<128x1xf32> to vector<128x128xf32>
    %104 = arith.mulf %102, %103 : vector<128x128xf32>
    %105 = arith.mulf %104, %104 : vector<128x128xf32>
    %cst_63 = arith.constant dense<0.000000e+00> : vector<128xf32>
    %106 = vector.multi_reduction <add>, %105, %cst_63 [0] : vector<128x128xf32> to vector<128xf32>
    %107 = vector.shape_cast %106 : vector<128xf32> to vector<1x128xf32>
    %cst_64 = arith.constant 6.250000e-02 : f32
    %108 = vector.broadcast %cst_64 : f32 to vector<1x128xf32>
    %109 = arith.mulf %107, %108 : vector<1x128xf32>
    %110 = vector.broadcast %100 : vector<1x128xf32> to vector<128x128xf32>
    %111 = arith.subf %94, %110 : vector<128x128xf32>
    %cst_65 = arith.constant 9.99999974E-6 : f32
    %112 = vector.broadcast %cst_65 : f32 to vector<1x128xf32>
    %113 = arith.addf %109, %112 : vector<1x128xf32>
    %114 = math.rsqrt %113 : vector<1x128xf32>
    %115 = vector.broadcast %114 : vector<1x128xf32> to vector<128x128xf32>
    %116 = arith.mulf %111, %115 : vector<128x128xf32>
    %c1_66 = arith.constant 1 : index
    %c0_67 = arith.constant 0 : index
    %c0_68 = arith.constant 0 : index
    %117 = vector.load %arg13[%c1_66, %c0_67, %c0_68] : memref<3x1x128xf32, #tpu.memory_space<vmem>>, vector<1x1x128xf32>
    %118 = vector.shape_cast %117 : vector<1x1x128xf32> to vector<1x128xf32>
    %119 = vector.broadcast %118 : vector<1x128xf32> to vector<128x128xf32>
    %120 = arith.mulf %116, %119 : vector<128x128xf32>
    %c1_69 = arith.constant 1 : index
    %c0_70 = arith.constant 0 : index
    %c0_71 = arith.constant 0 : index
    %121 = vector.load %arg14[%c1_69, %c0_70, %c0_71] : memref<3x1x128xf32, #tpu.memory_space<vmem>>, vector<1x1x128xf32>
    %122 = vector.shape_cast %121 : vector<1x1x128xf32> to vector<1x128xf32>
    %123 = vector.broadcast %122 : vector<1x128xf32> to vector<128x128xf32>
    %124 = arith.addf %120, %123 : vector<128x128xf32>
    %c1_72 = arith.constant 1 : index
    %125 = memref.load %arg15[%c1_72] : memref<3xf32, #tpu.memory_space<smem>>
    %126 = vector.broadcast %125 : f32 to vector<128x128xf32>
    %127 = arith.mulf %126, %124 : vector<128x128xf32>
    %128 = arith.addf %72, %127 : vector<128x128xf32>
    %129 = arith.truncf %124 : vector<128x128xf32> to vector<128x128xbf16>
    %cst_73 = arith.constant dense<0.000000e+00> : vector<128x128xf32>
    %130 = tpu.matmul %14, %129, %cst_73 {dimension_numbers = #tpu.dot_dimension_numbers<[1], [0], [0], [1], [0, 0, 1, 1], [], []>} : vector<128x128xbf16>, vector<128x128xbf16>, vector<128x128xf32> -> vector<128x128xf32>
    %131 = arith.truncf %130 : vector<128x128xf32> to vector<128x128xbf16>
    %c2 = arith.constant 2 : index
    %c0_74 = arith.constant 0 : index
    %c0_75 = arith.constant 0 : index
    %132 = vector.load %arg9[%c2, %c0_74, %c0_75] : memref<3x128x128xbf16, #tpu.memory_space<vmem>>, vector<1x128x128xbf16>
    %133 = vector.shape_cast %132 : vector<1x128x128xbf16> to vector<128x128xbf16>
    %cst_76 = arith.constant dense<0.000000e+00> : vector<128x128xf32>
    %134 = tpu.matmul %131, %133, %cst_76 {dimension_numbers = #tpu.dot_dimension_numbers<[1], [0], [0], [1], [0, 0, 1, 1], [], []>} : vector<128x128xbf16>, vector<128x128xbf16>, vector<128x128xf32> -> vector<128x128xf32>
    %c2_77 = arith.constant 2 : index
    %c0_78 = arith.constant 0 : index
    %c0_79 = arith.constant 0 : index
    %135 = vector.load %arg10[%c2_77, %c0_78, %c0_79] : memref<3x1x128xf32, #tpu.memory_space<vmem>>, vector<1x1x128xf32>
    %136 = vector.shape_cast %135 : vector<1x1x128xf32> to vector<1x128xf32>
    %137 = vector.broadcast %136 : vector<1x128xf32> to vector<128x128xf32>
    %138 = arith.addf %134, %137 : vector<128x128xf32>
    %cst_80 = arith.constant 0.000000e+00 : f32
    %139 = vector.broadcast %cst_80 : f32 to vector<128x128xf32>
    %140 = arith.maximumf %138, %139 : vector<128x128xf32>
    %141 = arith.truncf %140 : vector<128x128xf32> to vector<128x128xbf16>
    %c2_81 = arith.constant 2 : index
    %c0_82 = arith.constant 0 : index
    %c0_83 = arith.constant 0 : index
    %142 = vector.load %arg11[%c2_81, %c0_82, %c0_83] : memref<3x128x128xbf16, #tpu.memory_space<vmem>>, vector<1x128x128xbf16>
    %143 = vector.shape_cast %142 : vector<1x128x128xbf16> to vector<128x128xbf16>
    %cst_84 = arith.constant dense<0.000000e+00> : vector<128x128xf32>
    %144 = tpu.matmul %141, %143, %cst_84 {dimension_numbers = #tpu.dot_dimension_numbers<[1], [0], [0], [1], [0, 0, 1, 1], [], []>} : vector<128x128xbf16>, vector<128x128xbf16>, vector<128x128xf32> -> vector<128x128xf32>
    %c2_85 = arith.constant 2 : index
    %c0_86 = arith.constant 0 : index
    %c0_87 = arith.constant 0 : index
    %145 = vector.load %arg12[%c2_85, %c0_86, %c0_87] : memref<3x1x128xf32, #tpu.memory_space<vmem>>, vector<1x1x128xf32>
    %146 = vector.shape_cast %145 : vector<1x1x128xf32> to vector<1x128xf32>
    %147 = vector.broadcast %146 : vector<1x128xf32> to vector<128x128xf32>
    %148 = arith.addf %144, %147 : vector<128x128xf32>
    %cst_88 = arith.constant 0.000000e+00 : f32
    %149 = vector.broadcast %cst_88 : f32 to vector<128x128xf32>
    %150 = arith.maximumf %148, %149 : vector<128x128xf32>
    %151 = vector.broadcast %15 : vector<128x1xf32> to vector<128x128xf32>
    %152 = arith.mulf %150, %151 : vector<128x128xf32>
    %cst_89 = arith.constant dense<0.000000e+00> : vector<128xf32>
    %153 = vector.multi_reduction <add>, %152, %cst_89 [0] : vector<128x128xf32> to vector<128xf32>
    %154 = vector.shape_cast %153 : vector<128xf32> to vector<1x128xf32>
    %cst_90 = arith.constant 6.250000e-02 : f32
    %155 = vector.broadcast %cst_90 : f32 to vector<1x128xf32>
    %156 = arith.mulf %154, %155 : vector<1x128xf32>
    %157 = vector.broadcast %156 : vector<1x128xf32> to vector<128x128xf32>
    %158 = arith.subf %150, %157 : vector<128x128xf32>
    %159 = vector.broadcast %15 : vector<128x1xf32> to vector<128x128xf32>
    %160 = arith.mulf %158, %159 : vector<128x128xf32>
    %161 = arith.mulf %160, %160 : vector<128x128xf32>
    %cst_91 = arith.constant dense<0.000000e+00> : vector<128xf32>
    %162 = vector.multi_reduction <add>, %161, %cst_91 [0] : vector<128x128xf32> to vector<128xf32>
    %163 = vector.shape_cast %162 : vector<128xf32> to vector<1x128xf32>
    %cst_92 = arith.constant 6.250000e-02 : f32
    %164 = vector.broadcast %cst_92 : f32 to vector<1x128xf32>
    %165 = arith.mulf %163, %164 : vector<1x128xf32>
    %166 = vector.broadcast %156 : vector<1x128xf32> to vector<128x128xf32>
    %167 = arith.subf %150, %166 : vector<128x128xf32>
    %cst_93 = arith.constant 9.99999974E-6 : f32
    %168 = vector.broadcast %cst_93 : f32 to vector<1x128xf32>
    %169 = arith.addf %165, %168 : vector<1x128xf32>
    %170 = math.rsqrt %169 : vector<1x128xf32>
    %171 = vector.broadcast %170 : vector<1x128xf32> to vector<128x128xf32>
    %172 = arith.mulf %167, %171 : vector<128x128xf32>
    %c2_94 = arith.constant 2 : index
    %c0_95 = arith.constant 0 : index
    %c0_96 = arith.constant 0 : index
    %173 = vector.load %arg13[%c2_94, %c0_95, %c0_96] : memref<3x1x128xf32, #tpu.memory_space<vmem>>, vector<1x1x128xf32>
    %174 = vector.shape_cast %173 : vector<1x1x128xf32> to vector<1x128xf32>
    %175 = vector.broadcast %174 : vector<1x128xf32> to vector<128x128xf32>
    %176 = arith.mulf %172, %175 : vector<128x128xf32>
    %c2_97 = arith.constant 2 : index
    %c0_98 = arith.constant 0 : index
    %c0_99 = arith.constant 0 : index
    %177 = vector.load %arg14[%c2_97, %c0_98, %c0_99] : memref<3x1x128xf32, #tpu.memory_space<vmem>>, vector<1x1x128xf32>
    %178 = vector.shape_cast %177 : vector<1x1x128xf32> to vector<1x128xf32>
    %179 = vector.broadcast %178 : vector<1x128xf32> to vector<128x128xf32>
    %180 = arith.addf %176, %179 : vector<128x128xf32>
    %c2_100 = arith.constant 2 : index
    %181 = memref.load %arg15[%c2_100] : memref<3xf32, #tpu.memory_space<smem>>
    %182 = vector.broadcast %181 : f32 to vector<128x128xf32>
    %183 = arith.mulf %182, %180 : vector<128x128xf32>
    %184 = arith.addf %128, %183 : vector<128x128xf32>
    %c0_101 = arith.constant 0 : index
    %c0_102 = arith.constant 0 : index
    %185 = vector.load %arg2[%c0_101, %c0_102] : memref<8x128xbf16, #tpu.memory_space<vmem>>, vector<8x128xbf16>
    %186 = arith.truncf %184 : vector<128x128xf32> to vector<128x128xbf16>
    %cst_103 = arith.constant dense<0.000000e+00> : vector<8x128xf32>
    %187 = tpu.matmul %185, %186, %cst_103 {dimension_numbers = #tpu.dot_dimension_numbers<[1], [0], [0], [1], [0, 0, 1, 1], [], []>} : vector<8x128xbf16>, vector<128x128xbf16>, vector<8x128xf32> -> vector<8x128xf32>
    %c0_104 = arith.constant 0 : index
    %188 = memref.load %arg16[%c0_104] : memref<1xf32, #tpu.memory_space<smem>>
    %c0_105 = arith.constant 0 : index
    %c0_106 = arith.constant 0 : index
    %189 = vector.load %arg4[%c0_105, %c0_106] : memref<8x1xf32, #tpu.memory_space<vmem>>, vector<8x1xf32>
    %190 = vector.broadcast %188 : f32 to vector<8x1xf32>
    %191 = arith.mulf %190, %189 : vector<8x1xf32>
    %192 = vector.broadcast %191 : vector<8x1xf32> to vector<8x128xf32>
    %193 = arith.addf %187, %192 : vector<8x128xf32>
    %c0_107 = arith.constant 0 : index
    %c0_108 = arith.constant 0 : index
    %194 = vector.load %arg17[%c0_107, %c0_108] : memref<8x128xf32, #tpu.memory_space<vmem>>, vector<8x128xf32>
    tpu.vector_store %arg17[%c0_107, %c0_108], %193 {strides = array<i32>} : memref<8x128xf32, #tpu.memory_space<vmem>>, vector<8x128xf32>,
    return
  }
}

</mosaic_0001>

<bundles_post_ra>
// kernel: tpu_custom_call.1
= control target key start
LH: loop header
LB: loop body
LE: loop exit
PB: predicated region body
PF: predicated region fallthrough
CT: control target
= control target key end

     0   :  { %s4114_s0 = inlined_call_operand.vmem [shape: bf16[128,128], index: 0, kind: input, shape index: {}]   ;;  %s4115_s1 = inlined_call_operand.vmem [shape: bf16[128,128], index: 1, kind: input, shape index: {}]   ;;  %s4116_s2 = inlined_call_operand.vmem [shape: bf16[8,128], index: 2, kind: input, shape index: {}]   ;;  %s4117_s3 = inlined_call_operand.vmem [shape: f32[128,1], index: 3, kind: input, shape index: {}]   ;;  %s4118_s4 = inlined_call_operand.vmem [shape: f32[8,1], index: 4, kind: input, shape index: {}]   ;;  %s4119_s5 = inlined_call_operand.hbm [shape: bf16[128,128], index: 5, kind: input, shape index: {}]   ;;  %s4120_s6 = inlined_call_operand.vmem [shape: f32[1,128], index: 6, kind: input, shape index: {}]   ;;  %s4121_s7 = inlined_call_operand.hbm [shape: bf16[128,128], index: 7, kind: input, shape index: {}]   ;;  %s4122_s8 = inlined_call_operand.vmem [shape: f32[1,128], index: 8, kind: input, shape index: {}]   ;;  %s4123_s9 = inlined_call_operand.hbm [shape: bf16[3,128,128], index: 9, kind: input, shape index: {}]   ;;  %s4124_s10 = inlined_call_operand.vmem [shape: f32[3,1,128], index: 10, kind: input, shape index: {}]   ;;  %s4125_s11 = inlined_call_operand.hbm [shape: bf16[3,128,128], index: 11, kind: input, shape index: {}]   ;;  %s4126_s12 = inlined_call_operand.vmem [shape: f32[3,1,128], index: 12, kind: input, shape index: {}]   ;;  %s4127_s13 = inlined_call_operand.vmem [shape: f32[3,1,128], index: 13, kind: input, shape index: {}]   ;;  %s4128_s14 = inlined_call_operand.vmem [shape: f32[3,1,128], index: 14, kind: input, shape index: {}]   ;;  %s4129_s15 = inlined_call_operand.vmem [shape: f32[3], index: 15, kind: input, shape index: {}]   ;;  %s4130_s16 = inlined_call_operand.<no memory space> [shape: f32[1], index: 16, kind: input, shape index: {}]   ;;  %s4131_s17 = inlined_call_operand.hbm [shape: f32[8,128], index: 17, kind: output, shape index: {}]  }
   0x1   :  { %4186 = sst [smem:[#allocation32_spill]] %s4114_s0 }
   0x2   :  { %4187 = sst [smem:[#allocation33_spill]] %s4115_s1 }
   0x3   :  { %23 = vsyncpa [#allocation4], 0 }
   0x4   :  { %24 = vsyncpa [#allocation8], 0 }
   0x5   :  { %25 = vsyncpa [#allocation11], 0 }
   0x6   :  { %26 = vsyncpa [#allocation6], 0 }
   0x7   :  { %27 = vsyncpa [#allocation5], 0  ;;  %s57_s26 = sshll.u32 %s4121_s7, 4  ;;  %s2940_s27 = smov [#allocation7]   ;;  %s58_s26 = int_to_ptr.hbm [resolvable:$true] %s57_s26 }
   0x8   :  { %s59_s28 = sshll.u32 %s2940_s27, 4  ;;  %s42_s30 = sshll.u32 %s4119_s5, 4  ;;  %s60_s28 = int_to_ptr.vmem [resolvable:$true] %s59_s28  ;;  %s43_s30 = int_to_ptr.hbm [resolvable:$true] %s42_s30 }
   0x9   :  { %s2941_s18 = smov 64   ;;  %s2942_s19 = smov 4  }
   0xa   :  { %65 = dma.hbm_to_vmem [thread:$0]  %s58_s26, 1024, %s60_s28, [#allocation8], %s2941_s18, %s2941_s18, %s2942_s19  }
   0xb   :  { %s2943_s1 = smov [#allocation3]   ;;  %s72_s23 = sshll.u32 %s4123_s9, 4  ;;  %s73_s23 = int_to_ptr.hbm [resolvable:$true] %s72_s23 }
   0xc   :  { %s44_s20 = sshll.u32 %s2943_s1, 4  ;;  %s87_s25 = sshll.u32 %s4125_s11, 4  ;;  %s45_s20 = int_to_ptr.vmem [resolvable:$true] %s44_s20  ;;  %s88_s25 = int_to_ptr.hbm [resolvable:$true] %s87_s25 }
   0xd   :  { %50 = dma.hbm_to_vmem [thread:$0]  %s43_s30, 1024, %s45_s20, [#allocation4], %s2941_s18, %s2941_s18, %s2942_s19  }
   0xe   :  { %s2944_s27 = smov [#allocation9]   ;;  %s2945_s5 = smov [#allocation10]  }
   0xf   :  { %s74_s29 = sshll.u32 %s2944_s27, 4  ;;  %s89_s26 = sshll.u32 %s2945_s5, 4  ;;  %s75_s29 = int_to_ptr.vmem [resolvable:$true] %s74_s29  ;;  %s90_s26 = int_to_ptr.vmem [resolvable:$true] %s89_s26 }
  0x10   :  { %80 = dma.hbm_to_vmem [thread:$0]  %s73_s23, 3072, %s75_s29, [#allocation8], %s2941_s18, %s2941_s18, %s2942_s19  }
  0x11   :  { %s107_s1 = sshll.u32 %s4129_s15, 4  ;;  %s2946_s9 = smov [#allocation12]   ;;  %s108_s1 = int_to_ptr.vmem [resolvable:$true] %s107_s1 }
  0x12   :  { %95 = dma.hbm_to_vmem [thread:$0]  %s88_s25, 3072, %s90_s26, [#allocation11], %s2941_s18, %s2941_s18, %s2942_s19  }
  0x13   :  { %110 = dma.vmem_to_smem %s108_s1, 16, %s2946_s9, [#allocation6]  }
  0x14   :  { %2930 = dma.done.wait [#allocation4], 1024  }
  0x15   :  { %2931 = vsyncadd [#allocation4], 4294966272 }
  0x16   :  { %2932 = dma.done.wait [#allocation8], 4096  }
  0x17   :  { %2933 = vsyncadd [#allocation8], 4294963200 }
  0x18   :  { %2934 = dma.done.wait [#allocation11], 3072  }
  0x19   :  { %2935 = vsyncadd [#allocation11], 4294964224 }
  0x1a   :  { %2936 = dma.done.wait [#allocation6], 16  }
  0x1b   :  { %2937 = vsyncadd [#allocation6], 4294967280 }
  0x1c   :  { %133 = sfence }
  0x1d   :  { %v2669_v0 = vld [vmem:[#allocation3 + $0x38] sm:$0xff]  ;;  %v2668_v1 = vld [vmem:[#allocation3 + $0x30] sm:$0xff]  ;;  %v2667_v2 = vld [vmem:[#allocation3 + $0x28] sm:$0xff]  ;;  %s4188_s30 = sld [smem:[#allocation32_spill]]  ;;  %s2311_s21 = sshll.u32 %s4131_s17, 4  ;;  %s2312_s21 = int_to_ptr.hbm [resolvable:$true] %s2311_s21 }
  0x1e   :  { %266 = vmatpush.bf16.msra.mxu0 %v2669_v0  ;;  %2734 = vmatpush.bf16.msra.mxu3 %v2669_v0  ;;  %v2666_v3 = vld [vmem:[#allocation3 + $0x20] sm:$0xff]  ;;  %v2665_v4 = vld [vmem:[#allocation3 + $0x18] sm:$0xff]  ;;  %v2664_v5 = vld [vmem:[#allocation3 + $0x10] sm:$0xff]  ;;  %s4189_s15 = sld [smem:[#allocation33_spill]] }
  0x1f   :  { %v2663_v6 = vld [vmem:[#allocation3 + $0x8] sm:$0xff]  ;;  %v2662_v7 = vld [vmem:[#allocation3] sm:$0xff]  ;;  %v2677_v14 = vld [vmem:[#allocation7 + $0x38] sm:$0xff]  ;;  %s2584_s9 = sld [smem:[#allocation12 + $0x1]] }
  0x20   :  { %407 = vmatpush.bf16.msra.mxu1 %v2677_v14  ;;  %v2676_v15 = vld [vmem:[#allocation7 + $0x30] sm:$0xff]  ;;  %v2675_v16 = vld [vmem:[#allocation7 + $0x28] sm:$0xff]  ;;  %v2674_v17 = vld [vmem:[#allocation7 + $0x20] sm:$0xff] }
  0x21   :  { %v2673_v20 = vld [vmem:[#allocation7 + $0x18] sm:$0xff]  ;;  %v2672_v21 = vld [vmem:[#allocation7 + $0x10] sm:$0xff]  ;;  %v2671_v22 = vld [vmem:[#allocation7 + $0x8] sm:$0xff] }
  0x22   :  { %267 = vmatpush.bf16.msra.mxu0 %v2668_v1  ;;  %2735 = vmatpush.bf16.msra.mxu3 %v2668_v1  ;;  %v2670_v23 = vld [vmem:[#allocation7] sm:$0xff] }
  0x23   :  { %v2654_v8 = vld [vmem:[%s4188_s30] sm:$0xff]  ;;  %v2656_v9 = vld [vmem:[%s4188_s30 + $0x10] sm:$0xff]  ;;  %v2655_v10 = vld [vmem:[%s4188_s30 + $0x8] sm:$0xff] }
  0x24   :  { %v2657_v11 = vld [vmem:[%s4188_s30 + $0x18] sm:$0xff]  ;;  %v2658_v12 = vld [vmem:[%s4188_s30 + $0x20] sm:$0xff]  ;;  %v2659_v13 = vld [vmem:[%s4188_s30 + $0x28] sm:$0xff]  ;;  %408 = vmatpush.bf16.msra.mxu1 %v2676_v15 }
  0x25   :  { %v2660_v18 = vld [vmem:[%s4188_s30 + $0x30] sm:$0xff]  ;;  %v2661_v19 = vld [vmem:[%s4188_s30 + $0x38] sm:$0xff]  ;;  %v2770_v25 = vld [vmem:[%s4120_s6] ss:$0 sm:$0xff]  ;;  %s1130_s6 = sld [smem:[#allocation12]]  ;;  %s2948_s30 = smov [#allocation13]  }
  0x26   :  { %268 = vmatpush.bf16.msra.mxu0 %v2667_v2  ;;  %2736 = vmatpush.bf16.msra.mxu3 %v2667_v2  ;;  %s2309_s18 = sshll.u32 %s2948_s30, 4  ;;  %s2310_s18 = int_to_ptr.vmem [resolvable:$true] %s2309_s18 }
  0x28   :  { %409 = vmatpush.bf16.msra.mxu1 %v2675_v16 }
  0x2a   :  { %269 = vmatpush.bf16.msra.mxu0 %v2666_v3  ;;  %2737 = vmatpush.bf16.msra.mxu3 %v2666_v3 }
  0x2c   :  { %410 = vmatpush.bf16.msra.mxu1 %v2674_v17 }
  0x2e   :  { %270 = vmatpush.bf16.msra.mxu0 %v2665_v4  ;;  %2738 = vmatpush.bf16.msra.mxu3 %v2665_v4 }
  0x30   :  { %411 = vmatpush.bf16.msra.mxu1 %v2673_v20 }
  0x32   :  { %271 = vmatpush.bf16.msra.mxu0 %v2664_v5  ;;  %2739 = vmatpush.bf16.msra.mxu3 %v2664_v5 }
  0x34   :  { %412 = vmatpush.bf16.msra.mxu1 %v2672_v21 }
  0x36   :  { %272 = vmatpush.bf16.msra.mxu0 %v2663_v6  ;;  %2740 = vmatpush.bf16.msra.mxu3 %v2663_v6 }
  0x38   :  { %413 = vmatpush.bf16.msra.mxu1 %v2671_v22 }
  0x3a   :  { %273 = vmatpush.bf16.msra.mxu0 %v2662_v7  ;;  %2741 = vmatpush.bf16.msra.mxu3 %v2662_v7 }
  0x3c   :  { %414 = vmatpush.bf16.msra.mxu1 %v2670_v23 }
  0x3d   :  { %274 = vmatmul.bf16.vlgmr.msra.gmra.mxu0 %v2654_v8  ;;  %284 = vmatmul.bf16.vlgmr.msra.gmra.mxu3 %v2656_v9 }
  0x4d   :  { %279 = vmatmul.bf16.gmra.mxu0 %v2655_v10  ;;  %289 = vmatmul.bf16.gmra.mxu3 %v2657_v11 }
  0x5d   :  { %294 = vmatmul.bf16.gmra.mxu3 %v2658_v12 }
  0x6d   :  { %299 = vmatmul.bf16.gmra.mxu3 %v2659_v13 }
  0x7d   :  { %304 = vmatmul.bf16.gmra.mxu3 %v2660_v18 }
  0x8d   :  { %309 = vmatmul.bf16.gmra.mxu3 %v2661_v19 }
  0xba   :  { %v275_v24 = vpop.f32.mrf.mxu0 }
  0xbb   :  { %v276_v27 = vadd.f32 %v2770_v25, %v275_v24 }
  0xbd   :  { %v315_v30 = vmax.f32 %v276_v27, 0.0 }
  0xc0   :  { %v285_v26 = vpop.f32.mrf.mxu3 }
  0xc1   :  { %v286_v43 = vadd.f32 %v2770_v25, %v285_v26 }
  0xc2   :  { %v277_v28 = vpop.f32.mrf.mxu0 }
  0xc3   :  { %v278_v29 = vadd.f32 %v2770_v25, %v277_v28  ;;  %v319_v45 = vmax.f32 %v286_v43, 0.0 }
  0xc5   :  { %v316_v31 = vmax.f32 %v278_v29, 0.0 }
  0xc7   :  { %v331_v32 = vpack.c.bf16 %v316_v31, %v315_v30 }
  0xc8   :  { %v287_v33 = vpop.f32.mrf.mxu3 }
  0xc9   :  { %415 = vmatmul.bf16.vlgmr.msra.gmra.mxu1 %v331_v32  ;;  %v288_v44 = vadd.f32 %v2770_v25, %v287_v33 }
  0xca   :  { %v280_v34 = vpop.f32.mrf.mxu0 }
  0xcb   :  { %v281_v35 = vadd.f32 %v2770_v25, %v280_v34  ;;  %v320_v46 = vmax.f32 %v288_v44, 0.0 }
  0xcd   :  { %v317_v39 = vmax.f32 %v281_v35, 0.0  ;;  %v333_v48 = vpack.c.bf16 %v320_v46, %v319_v45 }
  0xd0   :  { %v290_v37 = vpop.f32.mrf.mxu3 }
  0xd1   :  { %v291_v49 = vadd.f32 %v2770_v25, %v290_v37 }
  0xd2   :  { %v282_v36 = vpop.f32.mrf.mxu0 }
  0xd3   :  { %v283_v38 = vadd.f32 %v2770_v25, %v282_v36  ;;  %v321_v52 = vmax.f32 %v291_v49, 0.0 }
  0xd5   :  { %v318_v40 = vmax.f32 %v283_v38, 0.0 }
  0xd7   :  { %v332_v41 = vpack.c.bf16 %v318_v40, %v317_v39 }
  0xd8   :  { %v292_v42 = vpop.f32.mrf.mxu3 }
  0xd9   :  { %420 = vmatmul.bf16.gmra.mxu1 %v332_v41  ;;  %v293_v50 = vadd.f32 %v2770_v25, %v292_v42 }
  0xdb   :  { %v322_v53 = vmax.f32 %v293_v50, 0.0 }
  0xdd   :  { %v334_v54 = vpack.c.bf16 %v322_v53, %v321_v52 }
  0xe0   :  { %v295_v47 = vpop.f32.mrf.mxu3 }
  0xe1   :  { %v296_v56 = vadd.f32 %v2770_v25, %v295_v47 }
  0xe3   :  { %v323_v58 = vmax.f32 %v296_v56, 0.0 }
  0xe8   :  { %v297_v51 = vpop.f32.mrf.mxu3 }
  0xe9   :  { %425 = vmatmul.bf16.gmra.mxu1 %v333_v48  ;;  %v298_v57 = vadd.f32 %v2770_v25, %v297_v51 }
  0xeb   :  { %v324_v59 = vmax.f32 %v298_v57, 0.0 }
  0xed   :  { %v335_v61 = vpack.c.bf16 %v324_v59, %v323_v58  ;;  %v3087_v58 = vld [vmem:[%s4189_s15] sm:$0xff]  ;;  %v3093_v59 = vld [vmem:[%s4189_s15 + $0x8] sm:$0xff] }
  0xf0   :  { %v300_v55 = vpop.f32.mrf.mxu3 }
  0xf1   :  { %v301_v63 = vadd.f32 %v2770_v25, %v300_v55 }
  0xf3   :  { %v325_v1 = vmax.f32 %v301_v63, 0.0  ;;  %v2693_v63 = vld [vmem:[#allocation9 + $0x38] sm:$0xff] }
  0xf4   :  { %669 = vmatpush.bf16.msrb.mxu3 %v2693_v63 }
  0xf8   :  { %v302_v60 = vpop.f32.mrf.mxu3 }
  0xf9   :  { %430 = vmatmul.bf16.gmra.mxu1 %v334_v54  ;;  %v303_v0 = vadd.f32 %v2770_v25, %v302_v60  ;;  %v3099_v60 = vld [vmem:[%s4189_s15 + $0x10] sm:$0xff] }
  0xfb   :  { %v326_v2 = vmax.f32 %v303_v0, 0.0  ;;  %v3117_v0 = vld [vmem:[%s4189_s15 + $0x28] sm:$0xff] }
  0xfd   :  { %v336_v3 = vpack.c.bf16 %v326_v2, %v325_v1  ;;  %v2692_v1 = vld [vmem:[#allocation9 + $0x30] sm:$0xff]  ;;  %v2691_v2 = vld [vmem:[#allocation9 + $0x28] sm:$0xff] }
  0xfe   :  { %670 = vmatpush.bf16.msrb.mxu3 %v2692_v1 }
 0x100   :  { %v305_v62 = vpop.f32.mrf.mxu3 }
 0x101   :  { %v306_v5 = vadd.f32 %v2770_v25, %v305_v62  ;;  %v3111_v62 = vld [vmem:[%s4189_s15 + $0x20] sm:$0xff] }
 0x102   :  { %671 = vmatpush.bf16.msrb.mxu3 %v2691_v2 }
 0x103   :  { %v327_v8 = vmax.f32 %v306_v5, 0.0  ;;  %v3123_v5 = vld [vmem:[%s4189_s15 + $0x30] sm:$0xff] }
 0x108   :  { %v307_v4 = vpop.f32.mrf.mxu3 }
 0x109   :  { %435 = vmatmul.bf16.gmra.mxu1 %v335_v61  ;;  %v308_v6 = vadd.f32 %v2770_v25, %v307_v4  ;;  %v3105_v61 = vld [vmem:[%s4189_s15 + $0x18] sm:$0xff] }
 0x10a   :  { %v2689_v4 = vld [vmem:[#allocation9 + $0x18] sm:$0xff] }
 0x10b   :  { %v328_v9 = vmax.f32 %v308_v6, 0.0  ;;  %v2688_v6 = vld [vmem:[#allocation9 + $0x10] sm:$0xff] }
 0x10d   :  { %v337_v10 = vpack.c.bf16 %v328_v9, %v327_v8  ;;  %v2686_v8 = vld [vmem:[#allocation9] sm:$0xff]  ;;  %v3129_v9 = vld [vmem:[%s4189_s15 + $0x38] sm:$0xff] }
 0x110   :  { %v310_v7 = vpop.f32.mrf.mxu3 }
 0x111   :  { %v311_v12 = vadd.f32 %v2770_v25, %v310_v7  ;;  %v2687_v7 = vld [vmem:[#allocation9 + $0x8] sm:$0xff] }
 0x113   :  { %v329_v14 = vmax.f32 %v311_v12, 0.0 }
 0x118   :  { %v312_v11 = vpop.f32.mrf.mxu3 }
 0x119   :  { %440 = vmatmul.bf16.gmra.mxu1 %v336_v3  ;;  %v313_v13 = vadd.f32 %v2770_v25, %v312_v11  ;;  %v2771_v25 = vld [vmem:[%s4122_s8] ss:$0 sm:$0xff] }
 0x11a   :  { %v2690_v3 = vld [vmem:[#allocation9 + $0x20] sm:$0xff] }
 0x11b   :  { %v330_v15 = vmax.f32 %v313_v13, 0.0  ;;  %672 = vmatpush.bf16.msrb.mxu3 %v2690_v3 }
 0x11d   :  { %v338_v16 = vpack.c.bf16 %v330_v15, %v329_v14 }
 0x11f   :  { %673 = vmatpush.bf16.msrb.mxu3 %v2689_v4 }
 0x123   :  { %674 = vmatpush.bf16.msrb.mxu3 %v2688_v6 }
 0x127   :  { %675 = vmatpush.bf16.msrb.mxu3 %v2687_v7 }
 0x129   :  { %445 = vmatmul.bf16.gmra.mxu1 %v337_v10 }
 0x12b   :  { %676 = vmatpush.bf16.msrb.mxu3 %v2686_v8 }
 0x139   :  { %450 = vmatmul.bf16.gmra.mxu1 %v338_v16 }
 0x146   :  { %v416_v17 = vpop.f32.mrf.mxu1 }
 0x147   :  { %v417_v56 = vadd.f32 %v2771_v25, %v416_v17 }
 0x14e   :  { %v418_v18 = vpop.f32.mrf.mxu1 }
 0x14f   :  { %v419_v54 = vadd.f32 %v2771_v25, %v418_v18 }
 0x151   :  { %v488_v57 = vpack.c.bf16 %v419_v54, %v417_v56 }
 0x156   :  { %v421_v19 = vpop.f32.mrf.mxu1 }
 0x157   :  { %v422_v53 = vadd.f32 %v2771_v25, %v421_v19 }
 0x15e   :  { %v423_v20 = vpop.f32.mrf.mxu1 }
 0x15f   :  { %v424_v51 = vadd.f32 %v2771_v25, %v423_v20 }
 0x161   :  { %v489_v55 = vpack.c.bf16 %v424_v51, %v422_v53 }
 0x166   :  { %v426_v21 = vpop.f32.mrf.mxu1 }
 0x167   :  { %v427_v50 = vadd.f32 %v2771_v25, %v426_v21 }
 0x16e   :  { %v428_v22 = vpop.f32.mrf.mxu1 }
 0x16f   :  { %v429_v48 = vadd.f32 %v2771_v25, %v428_v22 }
 0x171   :  { %v490_v52 = vpack.c.bf16 %v429_v48, %v427_v50 }
 0x176   :  { %v431_v23 = vpop.f32.mrf.mxu1 }
 0x177   :  { %v432_v47 = vadd.f32 %v2771_v25, %v431_v23 }
 0x17e   :  { %v433_v24 = vpop.f32.mrf.mxu1 }
 0x17f   :  { %v434_v45 = vadd.f32 %v2771_v25, %v433_v24 }
 0x181   :  { %v491_v49 = vpack.c.bf16 %v434_v45, %v432_v47  ;;  %v3138_v45 = vld [vmem:[%s4124_s10] ss:$0 sm:$0xff] }
 0x186   :  { %v436_v26 = vpop.f32.mrf.mxu1 }
 0x187   :  { %v437_v44 = vadd.f32 %v2771_v25, %v436_v26 }
 0x18e   :  { %v438_v27 = vpop.f32.mrf.mxu1 }
 0x18f   :  { %v439_v42 = vadd.f32 %v2771_v25, %v438_v27 }
 0x191   :  { %v492_v46 = vpack.c.bf16 %v439_v42, %v437_v44  ;;  %v472_v42 = vld [vmem:[%s4117_s3] sm:$0xff] }
 0x196   :  { %v441_v28 = vpop.f32.mrf.mxu1 }
 0x197   :  { %v442_v41 = vadd.f32 %v2771_v25, %v441_v28 }
 0x19e   :  { %v443_v29 = vpop.f32.mrf.mxu1 }
 0x19f   :  { %v444_v39 = vadd.f32 %v2771_v25, %v443_v29  ;;  %v2701_v29 = vld [vmem:[#allocation10 + $0x38] sm:$0xff] }
 0x1a0   :  { %810 = vmatpush.bf16.msrb.mxu0 %v2701_v29 }
 0x1a1   :  { %v493_v43 = vpack.c.bf16 %v444_v39, %v442_v41 }
 0x1a6   :  { %v446_v30 = vpop.f32.mrf.mxu1 }
 0x1a7   :  { %v447_v38 = vadd.f32 %v2771_v25, %v446_v30  ;;  %v2700_v30 = vld [vmem:[#allocation10 + $0x30] sm:$0xff] }
 0x1a8   :  { %811 = vmatpush.bf16.msrb.mxu0 %v2700_v30 }
 0x1ae   :  { %v448_v31 = vpop.f32.mrf.mxu1 }
 0x1af   :  { %v449_v36 = vadd.f32 %v2771_v25, %v448_v31 }
 0x1b1   :  { %v494_v40 = vpack.c.bf16 %v449_v36, %v447_v38  ;;  %v2695_v38 = vld [vmem:[#allocation10 + $0x8] sm:$0xff] }
 0x1b6   :  { %v451_v32 = vpop.f32.mrf.mxu1 }
 0x1b7   :  { %v452_v34 = vadd.f32 %v2771_v25, %v451_v32  ;;  %v2699_v32 = vld [vmem:[#allocation10 + $0x28] sm:$0xff] }
 0x1b8   :  { %812 = vmatpush.bf16.msrb.mxu0 %v2699_v32  ;;  %v485_v32 = vld [vmem:[%s4117_s3 + $0x68] sm:$0xff] }
 0x1be   :  { %v453_v33 = vpop.f32.mrf.mxu1 }
 0x1bf   :  { %v454_v35 = vadd.f32 %v2771_v25, %v453_v33  ;;  %v2698_v25 = vld [vmem:[#allocation10 + $0x20] sm:$0xff] }
 0x1c0   :  { %813 = vmatpush.bf16.msrb.mxu0 %v2698_v25 }
 0x1c1   :  { %v495_v37 = vpack.c.bf16 %v454_v35, %v452_v34  ;;  %v2697_v35 = vld [vmem:[#allocation10 + $0x18] sm:$0xff] }
 0x1c3   :  { %544 = vmatpush.bf16.msra.mxu2 %v495_v37  ;;  %v2696_v37 = vld [vmem:[#allocation10 + $0x10] sm:$0xff] }
 0x1c4   :  { %814 = vmatpush.bf16.msrb.mxu0 %v2697_v35 }
 0x1c7   :  { %545 = vmatpush.bf16.msra.mxu2 %v494_v40  ;;  %v2694_v40 = vld [vmem:[#allocation10] sm:$0xff] }
 0x1c8   :  { %815 = vmatpush.bf16.msrb.mxu0 %v2696_v37  ;;  %v2283_v37 = vstv %s4130_s16 }
 0x1cb   :  { %546 = vmatpush.bf16.msra.mxu2 %v493_v43  ;;  %v2947_v43 = vmov 0  }
 0x1cc   :  { %816 = vmatpush.bf16.msrb.mxu0 %v2695_v38  ;;  %2767 = vset.pattern.permute.xlu0 %v2947_v43 }
 0x1cd   :  { %2768 = vset.pattern.permute.xlu1 %v2947_v43  ;;  %877 = vperm.xlu0 %2767, %v472_v42  }
 0x1ce   :  { %2769 = vset.pattern.permute.xlu2 %v2947_v43 }
 0x1cf   :  { %547 = vmatpush.bf16.msra.mxu2 %v492_v46  ;;  %v473_v46 = vld [vmem:[%s4117_s3 + $0x8] sm:$0xff] }
 0x1d0   :  { %817 = vmatpush.bf16.msrb.mxu0 %v2694_v40  ;;  %v480_v40 = vld [vmem:[%s4117_s3 + $0x40] sm:$0xff] }
 0x1d3   :  { %548 = vmatpush.bf16.msra.mxu2 %v491_v49 }
 0x1d5   :  { %882 = vperm.xlu0 %2767, %v473_v46  }
 0x1d7   :  { %549 = vmatpush.bf16.msra.mxu2 %v490_v52  ;;  %v474_v52 = vld [vmem:[%s4117_s3 + $0x10] sm:$0xff] }
 0x1d8   :  { %887 = vperm.xlu1 %2768, %v474_v52  }
 0x1db   :  { %550 = vmatpush.bf16.msra.mxu2 %v489_v55  ;;  %v475_v55 = vld [vmem:[%s4117_s3 + $0x18] sm:$0xff] }
 0x1df   :  { %551 = vmatpush.bf16.msra.mxu2 %v488_v57 }
 0x1e0   :  { %892 = vperm.xlu1 %2768, %v475_v55  }
 0x1e2   :  { %552 = vmatmul.bf16.vlgmr.msra.gmra.mxu2 %v3087_v58 }
 0x1f2   :  { %557 = vmatmul.bf16.gmra.mxu2 %v3093_v59 }
 0x202   :  { %562 = vmatmul.bf16.gmra.mxu2 %v3099_v60 }
 0x212   :  { %567 = vmatmul.bf16.gmra.mxu2 %v3105_v61 }
 0x222   :  { %572 = vmatmul.bf16.gmra.mxu2 %v3111_v62 }
 0x232   :  { %577 = vmatmul.bf16.gmra.mxu2 %v3117_v0 }
 0x242   :  { %582 = vmatmul.bf16.gmra.mxu2 %v3123_v5 }
 0x252   :  { %587 = vmatmul.bf16.gmra.mxu2 %v3129_v9 }
 0x265   :  { %v553_v10 = vpop.f32.mrf.mxu2 }
 0x26d   :  { %v555_v11 = vpop.f32.mrf.mxu2 }
 0x26e   :  { %v593_v12 = vpack.c.bf16 %v555_v11, %v553_v10 }
 0x270   :  { %677 = vmatmul.bf16.vlgmr.msrb.gmra.mxu3 %v593_v12  ;;  %v478_v12 = vld [vmem:[%s4117_s3 + $0x30] sm:$0xff] }
 0x271   :  { %907 = vperm.xlu0 %2767, %v478_v12  }
 0x275   :  { %v558_v13 = vpop.f32.mrf.mxu2 }
 0x27d   :  { %v560_v14 = vpop.f32.mrf.mxu2 }
 0x27e   :  { %v594_v15 = vpack.c.bf16 %v560_v14, %v558_v13 }
 0x280   :  { %682 = vmatmul.bf16.gmra.mxu3 %v594_v15  ;;  %v476_v15 = vld [vmem:[%s4117_s3 + $0x20] sm:$0xff] }
 0x281   :  { %897 = vperm.xlu2 %2769, %v476_v15  }
 0x285   :  { %v563_v16 = vpop.f32.mrf.mxu2 }
 0x28d   :  { %v565_v17 = vpop.f32.mrf.mxu2 }
 0x28e   :  { %v595_v18 = vpack.c.bf16 %v565_v17, %v563_v16  ;;  %v479_v16 = vld [vmem:[%s4117_s3 + $0x38] sm:$0xff] }
 0x28f   :  { %912 = vperm.xlu1 %2768, %v479_v16  }
 0x290   :  { %687 = vmatmul.bf16.gmra.mxu3 %v595_v18 }
 0x295   :  { %v568_v19 = vpop.f32.mrf.mxu2 }
 0x29d   :  { %v570_v20 = vpop.f32.mrf.mxu2 }
 0x29e   :  { %v596_v21 = vpack.c.bf16 %v570_v20, %v568_v19 }
 0x2a0   :  { %692 = vmatmul.bf16.gmra.mxu3 %v596_v21 }
 0x2a5   :  { %v573_v22 = vpop.f32.mrf.mxu2 }
 0x2ad   :  { %v575_v23 = vpop.f32.mrf.mxu2 }
 0x2ae   :  { %v597_v24 = vpack.c.bf16 %v575_v23, %v573_v22  ;;  %v477_v22 = vld [vmem:[%s4117_s3 + $0x28] sm:$0xff] }
 0x2af   :  { %v481_v23 = vld [vmem:[%s4117_s3 + $0x48] sm:$0xff]  ;;  %902 = vperm.xlu2 %2769, %v477_v22  }
 0x2b0   :  { %697 = vmatmul.bf16.gmra.mxu3 %v597_v24  ;;  %922 = vperm.xlu0 %2767, %v481_v23  }
 0x2b5   :  { %v578_v26 = vpop.f32.mrf.mxu2 }
 0x2b7   :  { %917 = vperm.xlu2 %2769, %v480_v40  }
 0x2bd   :  { %v580_v27 = vpop.f32.mrf.mxu2 }
 0x2be   :  { %v598_v28 = vpack.c.bf16 %v580_v27, %v578_v26  ;;  %v482_v27 = vld [vmem:[%s4117_s3 + $0x50] sm:$0xff] }
 0x2bf   :  { %927 = vperm.xlu1 %2768, %v482_v27  }
 0x2c0   :  { %702 = vmatmul.bf16.gmra.mxu3 %v598_v28  ;;  %v484_v28 = vld [vmem:[%s4117_s3 + $0x60] sm:$0xff] }
 0x2c1   :  { %937 = vperm.xlu0 %2767, %v484_v28  }
 0x2c5   :  { %v583_v31 = vpop.f32.mrf.mxu2 }
 0x2c7   :  { %942 = vperm.xlu1 %2768, %v485_v32  }
 0x2cd   :  { %v585_v33 = vpop.f32.mrf.mxu2 }
 0x2ce   :  { %v599_v34 = vpack.c.bf16 %v585_v33, %v583_v31 }
 0x2d0   :  { %707 = vmatmul.bf16.gmra.mxu3 %v599_v34  ;;  %v487_v34 = vld [vmem:[%s4117_s3 + $0x78] sm:$0xff] }
 0x2d1   :  { %952 = vperm.xlu0 %2767, %v487_v34  }
 0x2d5   :  { %v588_v36 = vpop.f32.mrf.mxu2 }
 0x2dd   :  { %v590_v39 = vpop.f32.mrf.mxu2 }
 0x2de   :  { %v600_v41 = vpack.c.bf16 %v590_v39, %v588_v36  ;;  %v2282_v36 = vld [vmem:[%s4118_s4] sm:$0xff] }
 0x2df   :  { %v2284_v39 = vmul.f32 %v2283_v37, %v2282_v36 }
 0x2e0   :  { %712 = vmatmul.bf16.gmra.mxu3 %v600_v41 }
 0x2e1   :  { %2287 = vperm.xlu1 %2768, %v2284_v39  }
 0x2f3   :  { %v678_v44 = vpop.f32.mrf.mxu3 }
 0x2f4   :  { %v679_v47 = vadd.f32 %v3138_v45, %v678_v44 }
 0x2f6   :  { %v718_v50 = vmax.f32 %v679_v47, 0.0 }
 0x2fb   :  { %v680_v48 = vpop.f32.mrf.mxu3 }
 0x2fc   :  { %v681_v49 = vadd.f32 %v3138_v45, %v680_v48  ;;  %v483_v48 = vld [vmem:[%s4117_s3 + $0x58] sm:$0xff] }
 0x2fd   :  { %932 = vperm.xlu2 %2769, %v483_v48  }
 0x2fe   :  { %v719_v51 = vmax.f32 %v681_v49, 0.0 }
 0x300   :  { %v734_v53 = vpack.c.bf16 %v719_v51, %v718_v50  ;;  %v486_v50 = vld [vmem:[%s4117_s3 + $0x70] sm:$0xff] }
 0x302   :  { %818 = vmatmul.bf16.vlgmr.msrb.gmra.mxu0 %v734_v53 }
 0x303   :  { %v683_v54 = vpop.f32.mrf.mxu3 }
 0x304   :  { %v684_v56 = vadd.f32 %v3138_v45, %v683_v54 }
 0x305   :  { %947 = vperm.xlu2 %2769, %v486_v50  }
 0x306   :  { %v720_v1 = vmax.f32 %v684_v56, 0.0 }
 0x30b   :  { %v685_v57 = vpop.f32.mrf.mxu3 }
 0x30c   :  { %v686_v63 = vadd.f32 %v3138_v45, %v685_v57 }
 0x30e   :  { %v721_v2 = vmax.f32 %v686_v63, 0.0 }
 0x310   :  { %v735_v3 = vpack.c.bf16 %v721_v2, %v720_v1 }
 0x312   :  { %823 = vmatmul.bf16.gmra.mxu0 %v735_v3 }
 0x313   :  { %v688_v4 = vpop.f32.mrf.mxu3 }
 0x314   :  { %v689_v6 = vadd.f32 %v3138_v45, %v688_v4 }
 0x316   :  { %v722_v10 = vmax.f32 %v689_v6, 0.0 }
 0x31b   :  { %v690_v7 = vpop.f32.mrf.mxu3 }
 0x31c   :  { %v691_v8 = vadd.f32 %v3138_v45, %v690_v7 }
 0x31e   :  { %v723_v11 = vmax.f32 %v691_v8, 0.0  ;;  %v3207_v8 = vpop.permute.xlu0 %877 }
 0x320   :  { %v736_v13 = vpack.c.bf16 %v723_v11, %v722_v10  ;;  %v3212_v10 = vld [vmem:[%s4126_s12] ss:$0 sm:$0xff] }
 0x322   :  { %828 = vmatmul.bf16.gmra.mxu0 %v736_v13 }
 0x323   :  { %v693_v14 = vpop.f32.mrf.mxu3 }
 0x324   :  { %v694_v17 = vadd.f32 %v3138_v45, %v693_v14 }
 0x326   :  { %v724_v20 = vmax.f32 %v694_v17, 0.0  ;;  %v3221_v14 = vpop.permute.xlu0 %882 }
 0x32b   :  { %v695_v18 = vpop.f32.mrf.mxu3 }
 0x32c   :  { %v696_v19 = vadd.f32 %v3138_v45, %v695_v18 }
 0x32e   :  { %v725_v21 = vmax.f32 %v696_v19, 0.0  ;;  %v3230_v19 = vpop.permute.xlu1 %887 }
 0x330   :  { %v737_v24 = vpack.c.bf16 %v725_v21, %v724_v20 }
 0x332   :  { %833 = vmatmul.bf16.gmra.mxu0 %v737_v24 }
 0x333   :  { %v698_v26 = vpop.f32.mrf.mxu3 }
 0x334   :  { %v699_v29 = vadd.f32 %v3138_v45, %v698_v26 }
 0x336   :  { %v726_v25 = vmax.f32 %v699_v29, 0.0  ;;  %v3243_v29 = vpop.permute.xlu1 %892 }
 0x33b   :  { %v700_v30 = vpop.f32.mrf.mxu3 }
 0x33c   :  { %v701_v31 = vadd.f32 %v3138_v45, %v700_v30 }
 0x33e   :  { %v727_v33 = vmax.f32 %v701_v31, 0.0 }
 0x340   :  { %v738_v35 = vpack.c.bf16 %v727_v33, %v726_v25  ;;  %v3251_v25 = vpop.permute.xlu2 %897 }
 0x342   :  { %838 = vmatmul.bf16.gmra.mxu0 %v738_v35 }
 0x343   :  { %v703_v38 = vpop.f32.mrf.mxu3 }
 0x344   :  { %v704_v41 = vadd.f32 %v3138_v45, %v703_v38 }
 0x346   :  { %v728_v44 = vmax.f32 %v704_v41, 0.0 }
 0x34b   :  { %v705_v42 = vpop.f32.mrf.mxu3 }
 0x34c   :  { %v706_v43 = vadd.f32 %v3138_v45, %v705_v42 }
 0x34e   :  { %v729_v46 = vmax.f32 %v706_v43, 0.0 }
 0x350   :  { %v739_v47 = vpack.c.bf16 %v729_v46, %v728_v44  ;;  %v3257_v44 = vpop.permute.xlu2 %902 }
 0x352   :  { %843 = vmatmul.bf16.gmra.mxu0 %v739_v47  ;;  %v3262_v47 = vpop.permute.xlu0 %907 }
 0x353   :  { %v708_v49 = vpop.f32.mrf.mxu3 }
 0x354   :  { %v709_v51 = vadd.f32 %v3138_v45, %v708_v49 }
 0x356   :  { %v730_v54 = vmax.f32 %v709_v51, 0.0 }
 0x35b   :  { %v710_v52 = vpop.f32.mrf.mxu3 }
 0x35c   :  { %v711_v53 = vadd.f32 %v3138_v45, %v710_v52  ;;  %v3271_v52 = vpop.permute.xlu1 %912 }
 0x35d   :  { %4190 = vst [vmem:[#allocation19_spill] sm:$0xff] %v3271_v52 }
 0x35e   :  { %v731_v55 = vmax.f32 %v711_v53, 0.0 }
 0x360   :  { %v740_v56 = vpack.c.bf16 %v731_v55, %v730_v54  ;;  %v3277_v55 = vpop.permute.xlu2 %917 }
 0x361   :  { %4191 = vst [vmem:[#allocation20_spill] sm:$0xff] %v3277_v55 }
 0x362   :  { %848 = vmatmul.bf16.gmra.mxu0 %v740_v56 }
 0x363   :  { %v713_v57 = vpop.f32.mrf.mxu3 }
 0x364   :  { %v714_v63 = vadd.f32 %v3138_v45, %v713_v57 }
 0x366   :  { %v732_v3 = vmax.f32 %v714_v63, 0.0 }
 0x36b   :  { %v715_v1 = vpop.f32.mrf.mxu3 }
 0x36c   :  { %v716_v2 = vadd.f32 %v3138_v45, %v715_v1  ;;  %v3286_v1 = vpop.permute.xlu0 %922 }
 0x36d   :  { %4192 = vst [vmem:[#allocation21_spill] sm:$0xff] %v3286_v1 }
 0x36e   :  { %v733_v4 = vmax.f32 %v716_v2, 0.0 }
 0x370   :  { %v741_v6 = vpack.c.bf16 %v733_v4, %v732_v3 }
 0x372   :  { %853 = vmatmul.bf16.gmra.mxu0 %v741_v6 }
 0x37f   :  { %v819_v7 = vpop.f32.mrf.mxu0 }
 0x380   :  { %v3218_v13 = vadd.f32 %v3212_v10, %v819_v7 }
 0x382   :  { %v859_v15 = vmax.f32 %v3218_v13, 0.0 }
 0x384   :  { %v955_v20 = vmul.f32 %v3207_v8, %v859_v15 }
 0x387   :  { %v821_v11 = vpop.f32.mrf.mxu0 }
 0x388   :  { %v3215_v12 = vadd.f32 %v3212_v10, %v821_v11 }
 0x38a   :  { %v860_v45 = vmax.f32 %v3215_v12, 0.0 }
 0x38c   :  { %v956_v17 = vmul.f32 %v3221_v14, %v860_v45 }
 0x38e   :  { %v971_v22 = vadd.f32 %v956_v17, %v955_v20  ;;  %v3302_v20 = vpop.permute.xlu1 %927 }
 0x38f   :  { %v824_v16 = vpop.f32.mrf.mxu0  ;;  %4193 = vst [vmem:[#allocation22_spill] sm:$0xff] %v3302_v20 }
 0x390   :  { %v3228_v18 = vadd.f32 %v3212_v10, %v824_v16 }
 0x392   :  { %v861_v21 = vmax.f32 %v3228_v18, 0.0 }
 0x394   :  { %v957_v23 = vmul.f32 %v3230_v19, %v861_v21 }
 0x396   :  { %v972_v24 = vadd.f32 %v971_v22, %v957_v23 }
 0x397   :  { %v826_v26 = vpop.f32.mrf.mxu0 }
 0x398   :  { %v3240_v27 = vadd.f32 %v3212_v10, %v826_v26 }
 0x39a   :  { %v862_v28 = vmax.f32 %v3240_v27, 0.0 }
 0x39c   :  { %v958_v31 = vmul.f32 %v3243_v29, %v862_v28 }
 0x39e   :  { %v973_v34 = vadd.f32 %v972_v24, %v958_v31 }
 0x39f   :  { %v829_v30 = vpop.f32.mrf.mxu0 }
 0x3a0   :  { %v3249_v32 = vadd.f32 %v3212_v10, %v829_v30  ;;  %v3311_v30 = vpop.permute.xlu2 %932 }
 0x3a1   :  { %4194 = vst [vmem:[#allocation23_spill] sm:$0xff] %v3311_v30 }
 0x3a2   :  { %v863_v33 = vmax.f32 %v3249_v32, 0.0 }
 0x3a4   :  { %v959_v35 = vmul.f32 %v3251_v25, %v863_v33 }
 0x3a6   :  { %v974_v36 = vadd.f32 %v973_v34, %v959_v35 }
 0x3a7   :  { %v831_v37 = vpop.f32.mrf.mxu0 }
 0x3a8   :  { %v3260_v46 = vadd.f32 %v3212_v10, %v831_v37 }
 0x3aa   :  { %v864_v50 = vmax.f32 %v3260_v46, 0.0 }
 0x3ac   :  { %v960_v56 = vmul.f32 %v3257_v44, %v864_v50 }
 0x3ae   :  { %v975_v7 = vadd.f32 %v974_v36, %v960_v56 }
 0x3af   :  { %v834_v38 = vpop.f32.mrf.mxu0 }
 0x3b0   :  { %v3265_v49 = vadd.f32 %v3212_v10, %v834_v38 }
 0x3b2   :  { %v4141_v53 = vmax.f32 %v3265_v49, 0.0 }
 0x3b4   :  { %v961_v3 = vmul.f32 %v3262_v47, %v4141_v53 }
 0x3b6   :  { %v976_v23 = vadd.f32 %v975_v7, %v961_v3 }
 0x3b7   :  { %v836_v39 = vpop.f32.mrf.mxu0 }
 0x3b8   :  { %v3269_v51 = vadd.f32 %v3212_v10, %v836_v39 }
 0x3ba   :  { %v4140_v57 = vmax.f32 %v3269_v51, 0.0 }
 0x3bc   :  { %v962_v11 = vmul.f32 %v3271_v52, %v4140_v57 }
 0x3be   :  { %v977_v34 = vadd.f32 %v976_v23, %v962_v11  ;;  %v3337_v11 = vpop.permute.xlu1 %942 }
 0x3bf   :  { %v839_v40 = vpop.f32.mrf.mxu0  ;;  %4196 = vst [vmem:[#allocation25_spill] sm:$0xff] %v3337_v11 }
 0x3c0   :  { %v3275_v54 = vadd.f32 %v3212_v10, %v839_v40 }
 0x3c2   :  { %v4139_v4 = vmax.f32 %v3275_v54, 0.0 }
 0x3c4   :  { %v963_v22 = vmul.f32 %v3277_v55, %v4139_v4 }
 0x3c6   :  { %v978_v38 = vadd.f32 %v977_v34, %v963_v22 }
 0x3c7   :  { %v841_v41 = vpop.f32.mrf.mxu0 }
 0x3c8   :  { %v3284_v63 = vadd.f32 %v3212_v10, %v841_v41 }
 0x3ca   :  { %v4138_v16 = vmax.f32 %v3284_v63, 0.0 }
 0x3cc   :  { %v964_v31 = vmul.f32 %v3286_v1, %v4138_v16 }
 0x3cf   :  { %v844_v42 = vpop.f32.mrf.mxu0 }
 0x3d0   :  { %v3293_v6 = vadd.f32 %v3212_v10, %v844_v42  ;;  %v3327_v42 = vpop.permute.xlu0 %937 }
 0x3d1   :  { %4195 = vst [vmem:[#allocation24_spill] sm:$0xff] %v3327_v42 }
 0x3d2   :  { %v4137_v24 = vmax.f32 %v3293_v6, 0.0 }
 0x3d4   :  { %v965_v39 = vmul.f32 %v3302_v20, %v4137_v24 }
 0x3d7   :  { %v846_v43 = vpop.f32.mrf.mxu0 }
 0x3d8   :  { %v3300_v17 = vadd.f32 %v3212_v10, %v846_v43  ;;  %v979_v43 = vadd.f32 %v978_v38, %v964_v31  ;;  %v3342_v31 = vpop.permute.xlu2 %947 }
 0x3d9   :  { %4197 = vst [vmem:[#allocation26_spill] sm:$0xff] %v3342_v31 }
 0x3da   :  { %v4135_v35 = vmax.f32 %v3300_v17, 0.0 }
 0x3df   :  { %v849_v48 = vpop.f32.mrf.mxu0 }
 0x3e0   :  { %v3309_v26 = vadd.f32 %v3212_v10, %v849_v48  ;;  %v966_v48 = vmul.f32 %v3311_v30, %v4135_v35  ;;  %v3351_v35 = vpop.permute.xlu0 %952 }
 0x3e1   :  { %4198 = vst [vmem:[#allocation27_spill] sm:$0xff] %v3351_v35 }
 0x3e2   :  { %v4134_v40 = vmax.f32 %v3309_v26, 0.0 }
 0x3e4   :  { %v967_v3 = vmul.f32 %v3327_v42, %v4134_v40 }
 0x3e7   :  { %v851_v2 = vpop.f32.mrf.mxu0 }
 0x3e8   :  { %v3318_v36 = vadd.f32 %v3212_v10, %v851_v2  ;;  %v980_v2 = vadd.f32 %v979_v43, %v965_v39 }
 0x3ea   :  { %v4136_v56 = vmax.f32 %v3318_v36, 0.0  ;;  %v981_v22 = vadd.f32 %v980_v2, %v966_v48 }
 0x3ec   :  { %v968_v23 = vmul.f32 %v3337_v11, %v4136_v56 }
 0x3ef   :  { %v854_v37 = vpop.f32.mrf.mxu0 }
 0x3f0   :  { %v3325_v41 = vadd.f32 %v3212_v10, %v854_v37  ;;  %v982_v37 = vadd.f32 %v981_v22, %v967_v3 }
 0x3f2   :  { %v873_v7 = vmax.f32 %v3325_v41, 0.0  ;;  %v983_v43 = vadd.f32 %v982_v37, %v968_v23 }
 0x3f4   :  { %v969_v38 = vmul.f32 %v3342_v31, %v873_v7 }
 0x3f6   :  { %v984_v48 = vadd.f32 %v983_v43, %v969_v38 }
 0x3f7   :  { %v856_v34 = vpop.f32.mrf.mxu0 }
 0x3f8   :  { %v3348_v39 = vadd.f32 %v3212_v10, %v856_v34 }
 0x3fa   :  { %v874_v40 = vmax.f32 %v3348_v39, 0.0  ;;  %v4201_v39 = vmax.f32 %v3275_v54, 0.0 }
 0x3fc   :  { %v970_v2 = vmul.f32 %v3351_v35, %v874_v40 }
 0x3fe   :  { %v985_v56 = vadd.f32 %v984_v48, %v970_v2 }
 0x400   :  { %v986_v24 = vrot.slane %v985_v56, 4 }
 0x402   :  { %v987_v16 = vadd.f32 %v986_v24, %v985_v56  ;;  %v4200_v56 = vmax.f32 %v3269_v51, 0.0 }
 0x404   :  { %v988_v4 = vrot.slane %v987_v16, 2 }
 0x406   :  { %v989_v3 = vadd.f32 %v988_v4, %v987_v16 }
 0x408   :  { %v990_v22 = vrot.slane %v989_v3, 1 }
 0x40a   :  { %v991_v57 = vadd.f32 %v990_v22, %v989_v3  ;;  %v4202_v3 = vmax.f32 %v3284_v63, 0.0 }
 0x40c   :  { %v992_v53 = vmul.f32 0.0625, %v991_v57 }
 0x40e   :  { %v3356_v10 = vsub.f32 %v859_v15, %v992_v53  ;;  %v3360_v23 = vsub.f32 %v860_v45, %v992_v53  ;;  %v3364_v34 = vsub.f32 %v861_v21, %v992_v53  ;;  %v3368_v24 = vsub.f32 %v863_v33, %v992_v53 }
 0x40f   :  { %v3376_v15 = vsub.f32 %v862_v28, %v992_v53  ;;  %v3382_v21 = vsub.f32 %v864_v50, %v992_v53  ;;  %v4199_v33 = vmax.f32 %v3265_v49, 0.0  ;;  %v3394_v37 = vsub.f32 %v4200_v56, %v992_v53 }
 0x410   :  { %v1009_v4 = vmul.f32 %v3356_v10, %v3207_v8  ;;  %v1010_v13 = vmul.f32 %v3360_v23, %v3221_v14  ;;  %v1011_v12 = vmul.f32 %v3364_v34, %v3230_v19  ;;  %v1013_v27 = vmul.f32 %v3368_v24, %v3251_v25 }
 0x411   :  { %v1012_v32 = vmul.f32 %v3376_v15, %v3243_v29  ;;  %v3388_v57 = vsub.f32 %v4199_v33, %v992_v53  ;;  %v1014_v46 = vmul.f32 %v3382_v21, %v3257_v44  ;;  %v3400_v43 = vsub.f32 %v4201_v39, %v992_v53 }
 0x412   :  { %v1025_v45 = vmul.f32 %v1009_v4, %v1009_v4  ;;  %v1026_v18 = vmul.f32 %v1010_v13, %v1010_v13  ;;  %v1027_v28 = vmul.f32 %v1011_v12, %v1011_v12  ;;  %v1029_v48 = vmul.f32 %v1013_v27, %v1013_v27 }
 0x413   :  { %v1028_v50 = vmul.f32 %v1012_v32, %v1012_v32  ;;  %v1015_v49 = vmul.f32 %v3388_v57, %v3262_v47  ;;  %v3406_v22 = vsub.f32 %v4202_v3, %v992_v53  ;;  %v1016_v51 = vmul.f32 %v3394_v37, %v3271_v52 }
 0x414   :  { %v1041_v16 = vadd.f32 %v1026_v18, %v1025_v45  ;;  %v1030_v4 = vmul.f32 %v1014_v46, %v1014_v46  ;;  %v4203_v12 = vmax.f32 %v3293_v6, 0.0  ;;  %v1017_v54 = vmul.f32 %v3400_v43, %v3277_v55 }
 0x415   :  { %v1031_v18 = vmul.f32 %v1015_v49, %v1015_v49  ;;  %v4204_v33 = vmax.f32 %v3300_v17, 0.0  ;;  %v1018_v63 = vmul.f32 %v3406_v22, %v3286_v1  ;;  %v4205_v56 = vmax.f32 %v3309_v26, 0.0 }
 0x416   :  { %v1042_v38 = vadd.f32 %v1041_v16, %v1027_v28  ;;  %v1003_v45 = vsub.f32 %v4203_v12, %v992_v53  ;;  %v1032_v28 = vmul.f32 %v1016_v51, %v1016_v51  ;;  %v1033_v6 = vmul.f32 %v1017_v54, %v1017_v54 }
 0x417   :  { %v1004_v27 = vsub.f32 %v4204_v33, %v992_v53  ;;  %v1005_v46 = vsub.f32 %v4205_v56, %v992_v53  ;;  %v4206_v39 = vmax.f32 %v3318_v36, 0.0  ;;  %v1007_v3 = vsub.f32 %v873_v7, %v992_v53 }
 0x418   :  { %v1043_v2 = vadd.f32 %v1042_v38, %v1028_v50  ;;  %v1019_v50 = vmul.f32 %v1003_v45, %v3302_v20  ;;  %v1008_v26 = vsub.f32 %v874_v40, %v992_v53 }
 0x419   :  { %v1020_v49 = vmul.f32 %v1004_v27, %v3311_v30  ;;  %v1021_v51 = vmul.f32 %v1005_v46, %v3327_v42 }
 0x41a   :  { %v1044_v13 = vadd.f32 %v1043_v2, %v1029_v48  ;;  %v1006_v48 = vsub.f32 %v4206_v39, %v992_v53  ;;  %v1034_v2 = vmul.f32 %v1018_v63, %v1018_v63 }
 0x41b   :  { %v1037_v36 = vmul.f32 %v1021_v51, %v1021_v51 }
 0x41c   :  { %v1045_v32 = vadd.f32 %v1044_v13, %v1030_v4  ;;  %v1035_v4 = vmul.f32 %v1019_v50, %v1019_v50  ;;  %v1022_v12 = vmul.f32 %v1006_v48, %v3337_v11 }
 0x41e   :  { %v1046_v16 = vadd.f32 %v1045_v32, %v1031_v18  ;;  %v1036_v18 = vmul.f32 %v1020_v49, %v1020_v49  ;;  %v1023_v32 = vmul.f32 %v1007_v3, %v3342_v31  ;;  %v1038_v63 = vmul.f32 %v1022_v12, %v1022_v12 }
 0x420   :  { %v1047_v38 = vadd.f32 %v1046_v16, %v1032_v28  ;;  %v1024_v28 = vmul.f32 %v1008_v26, %v3351_v35  ;;  %v1039_v56 = vmul.f32 %v1023_v32, %v1023_v32 }
 0x422   :  { %v1048_v17 = vadd.f32 %v1047_v38, %v1033_v6  ;;  %v1040_v7 = vmul.f32 %v1024_v28, %v1024_v28 }
 0x424   :  { %v1049_v13 = vadd.f32 %v1048_v17, %v1034_v2 }
 0x426   :  { %v1050_v54 = vadd.f32 %v1049_v13, %v1035_v4 }
 0x428   :  { %v1051_v33 = vadd.f32 %v1050_v54, %v1036_v18 }
 0x42a   :  { %v1052_v16 = vadd.f32 %v1051_v33, %v1037_v36  ;;  %v2774_v36 = vld [vmem:[%s4127_s13] ss:$0 sm:$0xff] }
 0x42c   :  { %v1053_v41 = vadd.f32 %v1052_v16, %v1038_v63  ;;  %v2775_v16 = vld [vmem:[%s4128_s14] ss:$0 sm:$0xff] }
 0x42e   :  { %v1054_v6 = vadd.f32 %v1053_v41, %v1039_v56 }
 0x430   :  { %v1055_v38 = vadd.f32 %v1054_v6, %v1040_v7 }
 0x432   :  { %v1056_v50 = vrot.slane %v1055_v38, 4 }
 0x434   :  { %v1057_v39 = vadd.f32 %v1056_v50, %v1055_v38 }
 0x436   :  { %v1058_v53 = vrot.slane %v1057_v39, 2 }
 0x438   :  { %v1059_v40 = vadd.f32 %v1058_v53, %v1057_v39 }
 0x43a   :  { %v1060_v2 = vrot.slane %v1059_v40, 1 }
 0x43c   :  { %v1061_v49 = vadd.f32 %v1060_v2, %v1059_v40 }
 0x43e   :  { %v1062_v17 = vmul.f32 0.0625, %v1061_v49 }
 0x440   :  { %v1063_v4 = vadd.f32 1e-05, %v1062_v17 }
 0x442   :  { %2784 = vrsqrt.f32 %v1063_v4  ;;  %vm1070_vm1 = vweird.f32 %v1063_v4 }
 0x448   :  { %v2785_v51 = vpop.eup %2784 }
 0x449   :  { %v1065_v13 = vmul.f32 %v2785_v51, %v1063_v4  ;;  %vm1071_vm0 = vweird.f32 %v2785_v51 }
 0x44a   :  { %vm1072_vm2 = vmor %vm1070_vm1, %vm1071_vm0 }
 0x44b   :  { %v1066_v18 = vmul.f32 %v2785_v51, %v1065_v13 }
 0x44d   :  { %v1067_v54 = vmul.f32 0.5, %v1066_v18 }
 0x44f   :  { %v1068_v12 = vsub.f32 1.5, %v1067_v54 }
 0x451   :  { %v1069_v32 = vmul.f32 %v2785_v51, %v1068_v12 }
 0x453   :  { %v1073_v33 = vsel %vm1072_vm2, %v2785_v51, %v1069_v32 }
 0x454   :  { %v1089_v28 = vmul.f32 %v1073_v33, %v1008_v26  ;;  %v1088_v63 = vmul.f32 %v1073_v33, %v1007_v3  ;;  %v1086_v56 = vmul.f32 %v1073_v33, %v1005_v46  ;;  %v1087_v41 = vmul.f32 %v1073_v33, %v1006_v48 }
 0x455   :  { %v1084_v7 = vmul.f32 %v1073_v33, %v1003_v45  ;;  %v1085_v6 = vmul.f32 %v1073_v33, %v1004_v27  ;;  %v1082_v38 = vmul.f32 %v1073_v33, %v3400_v43  ;;  %v1083_v50 = vmul.f32 %v1073_v33, %v3406_v22 }
 0x456   :  { %v1108_v39 = vmul.f32 %v2774_v36, %v1088_v63  ;;  %v1109_v53 = vmul.f32 %v2774_v36, %v1089_v28  ;;  %v1106_v40 = vmul.f32 %v2774_v36, %v1086_v56  ;;  %v1107_v2 = vmul.f32 %v2774_v36, %v1087_v41 }
 0x457   :  { %v1102_v49 = vmul.f32 %v2774_v36, %v1082_v38  ;;  %v1103_v17 = vmul.f32 %v2774_v36, %v1083_v50  ;;  %v1104_v4 = vmul.f32 %v2774_v36, %v1084_v7  ;;  %v1105_v51 = vmul.f32 %v2774_v36, %v1085_v6 }
 0x458   :  { %v3438_v26 = vadd.f32 %v2775_v16, %v1108_v39  ;;  %v3440_v3 = vadd.f32 %v2775_v16, %v1109_v53  ;;  %v3448_v22 = vadd.f32 %v2775_v16, %v1106_v40  ;;  %v3450_v27 = vadd.f32 %v2775_v16, %v1107_v2 }
 0x459   :  { %v3442_v46 = vadd.f32 %v2775_v16, %v1102_v49  ;;  %v3444_v45 = vadd.f32 %v2775_v16, %v1103_v17  ;;  %v3454_v13 = vadd.f32 %v2775_v16, %v1104_v4  ;;  %v3456_v18 = vadd.f32 %v2775_v16, %v1105_v51 }
 0x45a   :  { %v1171_v43 = vpack.c.bf16 %v3440_v3, %v3438_v26  ;;  %v1170_v54 = vpack.c.bf16 %v3450_v27, %v3448_v22  ;;  %v1080_v12 = vmul.f32 %v1073_v33, %v3388_v57  ;;  %v1081_v32 = vmul.f32 %v1073_v33, %v3394_v37 }
 0x45b   :  { %v1168_v48 = vpack.c.bf16 %v3444_v45, %v3442_v46  ;;  %v1169_v28 = vpack.c.bf16 %v3456_v18, %v3454_v13  ;;  %v1078_v41 = vmul.f32 %v1073_v33, %v3368_v24  ;;  %v1079_v7 = vmul.f32 %v1073_v33, %v3382_v21 }
 0x45c   :  { %1172 = vmatpush.bf16.msrb.mxu1 %v1171_v43  ;;  %v1100_v63 = vmul.f32 %v2774_v36, %v1080_v12  ;;  %v1101_v56 = vmul.f32 %v2774_v36, %v1081_v32  ;;  %v1076_v6 = vmul.f32 %v1073_v33, %v3364_v34  ;;  %v1077_v38 = vmul.f32 %v1073_v33, %v3376_v15  ;;  %v2706_v12 = vld [vmem:[#allocation9 + $0x60] sm:$0xff]  ;;  %v2705_v32 = vld [vmem:[#allocation9 + $0x58] sm:$0xff] }
 0x45d   :  { %v1098_v37 = vmul.f32 %v2774_v36, %v1078_v41  ;;  %v1099_v39 = vmul.f32 %v2774_v36, %v1079_v7  ;;  %v1074_v40 = vmul.f32 %v1073_v33, %v3356_v10  ;;  %v1075_v2 = vmul.f32 %v1073_v33, %v3360_v23 }
 0x45e   :  { %v3468_v50 = vadd.f32 %v2775_v16, %v1100_v63  ;;  %v3470_v57 = vadd.f32 %v2775_v16, %v1101_v56  ;;  %v1096_v53 = vmul.f32 %v2774_v36, %v1076_v6  ;;  %v1097_v15 = vmul.f32 %v2774_v36, %v1077_v38 }
 0x45f   :  { %v3476_v21 = vadd.f32 %v2775_v16, %v1098_v37  ;;  %v3478_v34 = vadd.f32 %v2775_v16, %v1099_v39  ;;  %v1094_v49 = vmul.f32 %v2774_v36, %v1074_v40  ;;  %v1095_v10 = vmul.f32 %v2774_v36, %v1075_v2  ;;  %v2709_v36 = vld [vmem:[#allocation9 + $0x78] sm:$0xff] }
 0x460   :  { %1173 = vmatpush.bf16.msrb.mxu1 %v1170_v54  ;;  %v1167_v24 = vpack.c.bf16 %v3470_v57, %v3468_v50  ;;  %v3482_v4 = vadd.f32 %v2775_v16, %v1096_v53  ;;  %v3484_v51 = vadd.f32 %v2775_v16, %v1097_v15  ;;  %1299 = vmatpush.bf16.msrb.mxu2 %v2709_v36  ;;  %v2708_v54 = vld [vmem:[#allocation9 + $0x70] sm:$0xff]  ;;  %v2717_v15 = vld [vmem:[#allocation10 + $0x78] sm:$0xff] }
 0x461   :  { %v1166_v17 = vpack.c.bf16 %v3478_v34, %v3476_v21  ;;  %v3488_v33 = vadd.f32 %v2775_v16, %v1094_v49  ;;  %v3490_v43 = vadd.f32 %v2775_v16, %v1095_v10  ;;  %v2707_v16 = vld [vmem:[#allocation9 + $0x68] sm:$0xff]  ;;  %1442 = vmatpush.bf16.msra.mxu3 %v2717_v15  ;;  %v2716_v49 = vld [vmem:[#allocation10 + $0x70] sm:$0xff] }
 0x462   :  { %4207 = vst [vmem:[#allocation28_spill] sm:$0xff] %v3482_v4  ;;  %v1165_v23 = vpack.c.bf16 %v3484_v51, %v3482_v4  ;;  %v2715_v10 = vld [vmem:[#allocation10 + $0x68] sm:$0xff] }
 0x463   :  { %4208 = vst [vmem:[#allocation29_spill] sm:$0xff] %v3484_v51 }
 0x464   :  { %1174 = vmatpush.bf16.msrb.mxu1 %v1169_v28  ;;  %4209 = vst [vmem:[#allocation30_spill] sm:$0xff] %v3488_v33  ;;  %1300 = vmatpush.bf16.msrb.mxu2 %v2708_v54 }
 0x465   :  { %4210 = vst [vmem:[#allocation31_spill] sm:$0xff] %v3490_v43  ;;  %1443 = vmatpush.bf16.msra.mxu3 %v2716_v49 }
 0x468   :  { %1175 = vmatpush.bf16.msrb.mxu1 %v1168_v48  ;;  %v1164_v48 = vpack.c.bf16 %v3490_v43, %v3488_v33  ;;  %1301 = vmatpush.bf16.msrb.mxu2 %v2707_v16  ;;  %v2713_v16 = vld [vmem:[#allocation10 + $0x58] sm:$0xff] }
 0x469   :  { %1444 = vmatpush.bf16.msra.mxu3 %v2715_v10 }
 0x46c   :  { %1176 = vmatpush.bf16.msrb.mxu1 %v1167_v24  ;;  %1302 = vmatpush.bf16.msrb.mxu2 %v2706_v12  ;;  %v2712_v12 = vld [vmem:[#allocation10 + $0x50] sm:$0xff] }
 0x470   :  { %1177 = vmatpush.bf16.msrb.mxu1 %v1166_v17  ;;  %1303 = vmatpush.bf16.msrb.mxu2 %v2705_v32 }
 0x474   :  { %1178 = vmatpush.bf16.msrb.mxu1 %v1165_v23  ;;  %v2714_v23 = vld [vmem:[#allocation10 + $0x60] sm:$0xff] }
 0x475   :  { %1445 = vmatpush.bf16.msra.mxu3 %v2714_v23 }
 0x478   :  { %1179 = vmatpush.bf16.msrb.mxu1 %v1164_v48 }
 0x479   :  { %1446 = vmatpush.bf16.msra.mxu3 %v2713_v16 }
 0x47b   :  { %1180 = vmatmul.bf16.vlgmr.msrb.gmra.mxu1 %v3087_v58  ;;  %v2704_v58 = vld [vmem:[#allocation9 + $0x50] sm:$0xff] }
 0x47c   :  { %1304 = vmatpush.bf16.msrb.mxu2 %v2704_v58 }
 0x47d   :  { %1447 = vmatpush.bf16.msra.mxu3 %v2712_v12 }
 0x48b   :  { %1185 = vmatmul.bf16.gmra.mxu1 %v3093_v59  ;;  %v2703_v59 = vld [vmem:[#allocation9 + $0x48] sm:$0xff] }
 0x48c   :  { %1305 = vmatpush.bf16.msrb.mxu2 %v2703_v59  ;;  %v2711_v59 = vld [vmem:[#allocation10 + $0x48] sm:$0xff] }
 0x48d   :  { %1448 = vmatpush.bf16.msra.mxu3 %v2711_v59 }
 0x49b   :  { %1190 = vmatmul.bf16.gmra.mxu1 %v3099_v60  ;;  %v2702_v60 = vld [vmem:[#allocation9 + $0x40] sm:$0xff] }
 0x49c   :  { %1306 = vmatpush.bf16.msrb.mxu2 %v2702_v60  ;;  %v2710_v60 = vld [vmem:[#allocation10 + $0x40] sm:$0xff] }
 0x49d   :  { %1449 = vmatpush.bf16.msra.mxu3 %v2710_v60 }
 0x4ab   :  { %1195 = vmatmul.bf16.gmra.mxu1 %v3105_v61 }
 0x4bb   :  { %1200 = vmatmul.bf16.gmra.mxu1 %v3111_v62 }
 0x4cb   :  { %1205 = vmatmul.bf16.gmra.mxu1 %v3117_v0 }
 0x4db   :  { %1210 = vmatmul.bf16.gmra.mxu1 %v3123_v5 }
 0x4eb   :  { %1215 = vmatmul.bf16.gmra.mxu1 %v3129_v9 }
 0x4f8   :  { %v1181_v61 = vpop.f32.mrf.mxu1 }
 0x500   :  { %v1183_v62 = vpop.f32.mrf.mxu1 }
 0x501   :  { %v1221_v28 = vpack.c.bf16 %v1183_v62, %v1181_v61  ;;  %v2776_v62 = vld [vmem:[%s4124_s10 + $0x1] ss:$0 sm:$0xff] }
 0x503   :  { %1307 = vmatmul.bf16.vlgmr.msrb.gmra.mxu2 %v1221_v28 }
 0x508   :  { %v1186_v0 = vpop.f32.mrf.mxu1 }
 0x510   :  { %v1188_v63 = vpop.f32.mrf.mxu1 }
 0x511   :  { %v1222_v56 = vpack.c.bf16 %v1188_v63, %v1186_v0 }
 0x513   :  { %1312 = vmatmul.bf16.gmra.mxu2 %v1222_v56 }
 0x518   :  { %v1191_v41 = vpop.f32.mrf.mxu1 }
 0x520   :  { %v1193_v7 = vpop.f32.mrf.mxu1 }
 0x521   :  { %v1223_v6 = vpack.c.bf16 %v1193_v7, %v1191_v41 }
 0x523   :  { %1317 = vmatmul.bf16.gmra.mxu2 %v1223_v6 }
 0x528   :  { %v1196_v38 = vpop.f32.mrf.mxu1 }
 0x530   :  { %v1198_v37 = vpop.f32.mrf.mxu1 }
 0x531   :  { %v1224_v5 = vpack.c.bf16 %v1198_v37, %v1196_v38 }
 0x533   :  { %1322 = vmatmul.bf16.gmra.mxu2 %v1224_v5 }
 0x538   :  { %v1201_v39 = vpop.f32.mrf.mxu1 }
 0x540   :  { %v1203_v53 = vpop.f32.mrf.mxu1 }
 0x541   :  { %v1225_v40 = vpack.c.bf16 %v1203_v53, %v1201_v39 }
 0x543   :  { %1327 = vmatmul.bf16.gmra.mxu2 %v1225_v40 }
 0x548   :  { %v1206_v9 = vpop.f32.mrf.mxu1 }
 0x550   :  { %v1208_v2 = vpop.f32.mrf.mxu1 }
 0x551   :  { %v1226_v24 = vpack.c.bf16 %v1208_v2, %v1206_v9 }
 0x553   :  { %1332 = vmatmul.bf16.gmra.mxu2 %v1226_v24 }
 0x558   :  { %v1211_v17 = vpop.f32.mrf.mxu1 }
 0x560   :  { %v1213_v48 = vpop.f32.mrf.mxu1 }
 0x561   :  { %v1227_v36 = vpack.c.bf16 %v1213_v48, %v1211_v17 }
 0x563   :  { %1337 = vmatmul.bf16.gmra.mxu2 %v1227_v36 }
 0x568   :  { %v1216_v54 = vpop.f32.mrf.mxu1 }
 0x570   :  { %v1218_v32 = vpop.f32.mrf.mxu1 }
 0x571   :  { %v1228_v58 = vpack.c.bf16 %v1218_v32, %v1216_v54 }
 0x573   :  { %1342 = vmatmul.bf16.gmra.mxu2 %v1228_v58 }
 0x586   :  { %v1308_v61 = vpop.f32.mrf.mxu2 }
 0x587   :  { %v1309_v28 = vadd.f32 %v2776_v62, %v1308_v61 }
 0x589   :  { %v1348_v56 = vmax.f32 %v1309_v28, 0.0 }
 0x58e   :  { %v1310_v0 = vpop.f32.mrf.mxu2 }
 0x58f   :  { %v1311_v63 = vadd.f32 %v2776_v62, %v1310_v0 }
 0x591   :  { %v1349_v41 = vmax.f32 %v1311_v63, 0.0 }
 0x593   :  { %v1364_v7 = vpack.c.bf16 %v1349_v41, %v1348_v56 }
 0x595   :  { %1450 = vmatmul.bf16.vlgmr.msra.gmra.mxu3 %v1364_v7 }
 0x596   :  { %v1313_v6 = vpop.f32.mrf.mxu2 }
 0x597   :  { %v1314_v38 = vadd.f32 %v2776_v62, %v1313_v6 }
 0x599   :  { %v1350_v39 = vmax.f32 %v1314_v38, 0.0 }
 0x59e   :  { %v1315_v37 = vpop.f32.mrf.mxu2 }
 0x59f   :  { %v1316_v5 = vadd.f32 %v2776_v62, %v1315_v37 }
 0x5a1   :  { %v1351_v53 = vmax.f32 %v1316_v5, 0.0 }
 0x5a3   :  { %v1365_v40 = vpack.c.bf16 %v1351_v53, %v1350_v39 }
 0x5a5   :  { %1455 = vmatmul.bf16.gmra.mxu3 %v1365_v40 }
 0x5a6   :  { %v1318_v9 = vpop.f32.mrf.mxu2 }
 0x5a7   :  { %v1319_v2 = vadd.f32 %v2776_v62, %v1318_v9 }
 0x5a9   :  { %v1352_v49 = vmax.f32 %v1319_v2, 0.0 }
 0x5ae   :  { %v1320_v24 = vpop.f32.mrf.mxu2 }
 0x5af   :  { %v1321_v15 = vadd.f32 %v2776_v62, %v1320_v24 }
 0x5b1   :  { %v1353_v17 = vmax.f32 %v1321_v15, 0.0 }
 0x5b3   :  { %v1366_v10 = vpack.c.bf16 %v1353_v17, %v1352_v49 }
 0x5b5   :  { %1460 = vmatmul.bf16.gmra.mxu3 %v1366_v10 }
 0x5b6   :  { %v1323_v23 = vpop.f32.mrf.mxu2 }
 0x5b7   :  { %v1324_v48 = vadd.f32 %v2776_v62, %v1323_v23 }
 0x5b9   :  { %v1354_v16 = vmax.f32 %v1324_v48, 0.0 }
 0x5be   :  { %v1325_v36 = vpop.f32.mrf.mxu2 }
 0x5bf   :  { %v1326_v54 = vadd.f32 %v2776_v62, %v1325_v36 }
 0x5c1   :  { %v1355_v12 = vmax.f32 %v1326_v54, 0.0 }
 0x5c3   :  { %v1367_v32 = vpack.c.bf16 %v1355_v12, %v1354_v16  ;;  %v3508_v12 = vld [vmem:[%s4126_s12 + $0x1] ss:$0 sm:$0xff] }
 0x5c5   :  { %1465 = vmatmul.bf16.gmra.mxu3 %v1367_v32 }
 0x5c6   :  { %v1328_v58 = vpop.f32.mrf.mxu2 }
 0x5c7   :  { %v1329_v59 = vadd.f32 %v2776_v62, %v1328_v58 }
 0x5c9   :  { %v1356_v28 = vmax.f32 %v1329_v59, 0.0 }
 0x5ce   :  { %v1330_v60 = vpop.f32.mrf.mxu2 }
 0x5cf   :  { %v1331_v61 = vadd.f32 %v2776_v62, %v1330_v60 }
 0x5d1   :  { %v1357_v0 = vmax.f32 %v1331_v61, 0.0 }
 0x5d3   :  { %v1368_v63 = vpack.c.bf16 %v1357_v0, %v1356_v28 }
 0x5d5   :  { %1470 = vmatmul.bf16.gmra.mxu3 %v1368_v63 }
 0x5d6   :  { %v1333_v56 = vpop.f32.mrf.mxu2 }
 0x5d7   :  { %v1334_v41 = vadd.f32 %v2776_v62, %v1333_v56 }
 0x5d9   :  { %v1358_v38 = vmax.f32 %v1334_v41, 0.0 }
 0x5de   :  { %v1335_v7 = vpop.f32.mrf.mxu2 }
 0x5df   :  { %v1336_v6 = vadd.f32 %v2776_v62, %v1335_v7 }
 0x5e1   :  { %v1359_v37 = vmax.f32 %v1336_v6, 0.0 }
 0x5e3   :  { %v1369_v5 = vpack.c.bf16 %v1359_v37, %v1358_v38 }
 0x5e5   :  { %1475 = vmatmul.bf16.gmra.mxu3 %v1369_v5 }
 0x5e6   :  { %v1338_v39 = vpop.f32.mrf.mxu2 }
 0x5e7   :  { %v1339_v53 = vadd.f32 %v2776_v62, %v1338_v39 }
 0x5e9   :  { %v1360_v2 = vmax.f32 %v1339_v53, 0.0 }
 0x5ee   :  { %v1340_v40 = vpop.f32.mrf.mxu2 }
 0x5ef   :  { %v1341_v9 = vadd.f32 %v2776_v62, %v1340_v40 }
 0x5f1   :  { %v1361_v24 = vmax.f32 %v1341_v9, 0.0 }
 0x5f3   :  { %v1370_v15 = vpack.c.bf16 %v1361_v24, %v1360_v2 }
 0x5f5   :  { %1480 = vmatmul.bf16.gmra.mxu3 %v1370_v15 }
 0x5f6   :  { %v1343_v49 = vpop.f32.mrf.mxu2 }
 0x5f7   :  { %v1344_v17 = vadd.f32 %v2776_v62, %v1343_v49 }
 0x5f9   :  { %v1362_v48 = vmax.f32 %v1344_v17, 0.0 }
 0x5fe   :  { %v1345_v10 = vpop.f32.mrf.mxu2 }
 0x5ff   :  { %v1346_v23 = vadd.f32 %v2776_v62, %v1345_v10 }
 0x601   :  { %v1363_v36 = vmax.f32 %v1346_v23, 0.0 }
 0x603   :  { %v1371_v54 = vpack.c.bf16 %v1363_v36, %v1362_v48 }
 0x605   :  { %1485 = vmatmul.bf16.gmra.mxu3 %v1371_v54 }
 0x618   :  { %v1451_v16 = vpop.f32.mrf.mxu3 }
 0x619   :  { %v3511_v32 = vadd.f32 %v3508_v12, %v1451_v16 }
 0x61b   :  { %v4151_v59 = vmax.f32 %v3511_v32, 0.0 }
 0x61d   :  { %v1507_v61 = vmul.f32 %v4151_v59, %v3207_v8 }
 0x620   :  { %v1453_v58 = vpop.f32.mrf.mxu3 }
 0x621   :  { %v3515_v60 = vadd.f32 %v3508_v12, %v1453_v58 }
 0x623   :  { %v4149_v62 = vmax.f32 %v3515_v60, 0.0 }
 0x625   :  { %v1508_v28 = vmul.f32 %v4149_v62, %v3221_v14 }
 0x627   :  { %v1523_v0 = vadd.f32 %v1508_v28, %v1507_v61 }
 0x628   :  { %v1456_v63 = vpop.f32.mrf.mxu3 }
 0x629   :  { %v3525_v56 = vadd.f32 %v3508_v12, %v1456_v63 }
 0x62b   :  { %v4147_v41 = vmax.f32 %v3525_v56, 0.0 }
 0x62d   :  { %v1509_v7 = vmul.f32 %v4147_v41, %v3230_v19 }
 0x62f   :  { %v1524_v6 = vadd.f32 %v1523_v0, %v1509_v7 }
 0x630   :  { %v1458_v38 = vpop.f32.mrf.mxu3 }
 0x631   :  { %v3532_v37 = vadd.f32 %v3508_v12, %v1458_v38 }
 0x633   :  { %v4145_v5 = vmax.f32 %v3532_v37, 0.0 }
 0x635   :  { %v1510_v39 = vmul.f32 %v4145_v5, %v3243_v29 }
 0x637   :  { %v1525_v53 = vadd.f32 %v1524_v6, %v1510_v39 }
 0x638   :  { %v1461_v40 = vpop.f32.mrf.mxu3 }
 0x639   :  { %v3539_v9 = vadd.f32 %v3508_v12, %v1461_v40 }
 0x63b   :  { %v4142_v2 = vmax.f32 %v3539_v9, 0.0 }
 0x63d   :  { %v1511_v24 = vmul.f32 %v4142_v2, %v3251_v25 }
 0x63f   :  { %v1526_v15 = vadd.f32 %v1525_v53, %v1511_v24 }
 0x640   :  { %v1463_v49 = vpop.f32.mrf.mxu3 }
 0x641   :  { %v3546_v16 = vadd.f32 %v3508_v12, %v1463_v49 }
 0x643   :  { %v1496_v28 = vmax.f32 %v3546_v16, 0.0 }
 0x645   :  { %v1512_v6 = vmul.f32 %v1496_v28, %v3257_v44 }
 0x648   :  { %v1466_v17 = vpop.f32.mrf.mxu3 }
 0x649   :  { %v3549_v61 = vadd.f32 %v3508_v12, %v1466_v17  ;;  %v1527_v17 = vadd.f32 %v1526_v15, %v1512_v6 }
 0x64b   :  { %v1497_v63 = vmax.f32 %v3549_v61, 0.0 }
 0x64d   :  { %v1513_v40 = vmul.f32 %v1497_v63, %v3262_v47 }
 0x650   :  { %v1468_v10 = vpop.f32.mrf.mxu3 }
 0x651   :  { %v3553_v0 = vadd.f32 %v3508_v12, %v1468_v10 }
 0x653   :  { %v4143_v38 = vmax.f32 %v3553_v0, 0.0 }
 0x655   :  { %v1514_v10 = vmul.f32 %v4143_v38, %v3271_v52 }
 0x658   :  { %v1471_v23 = vpop.f32.mrf.mxu3 }
 0x659   :  { %v3557_v7 = vadd.f32 %v3508_v12, %v1471_v23 }
 0x65b   :  { %v4144_v24 = vmax.f32 %v3557_v7, 0.0 }
 0x65d   :  { %v1515_v61 = vmul.f32 %v4144_v24, %v3277_v55 }
 0x660   :  { %v1473_v48 = vpop.f32.mrf.mxu3 }
 0x661   :  { %v3562_v39 = vadd.f32 %v3508_v12, %v1473_v48  ;;  %v1528_v48 = vadd.f32 %v1527_v17, %v1513_v40 }
 0x663   :  { %v4146_v23 = vmax.f32 %v3562_v39, 0.0  ;;  %v1529_v15 = vadd.f32 %v1528_v48, %v1514_v10 }
 0x665   :  { %v1516_v6 = vmul.f32 %v4146_v23, %v3286_v1  ;;  %v1530_v17 = vadd.f32 %v1529_v15, %v1515_v61 }
 0x667   :  { %v1531_v10 = vadd.f32 %v1530_v17, %v1516_v6 }
 0x668   :  { %v1476_v36 = vpop.f32.mrf.mxu3 }
 0x669   :  { %v3567_v49 = vadd.f32 %v3508_v12, %v1476_v36 }
 0x66b   :  { %v4148_v2 = vmax.f32 %v3567_v49, 0.0 }
 0x66d   :  { %v1517_v24 = vmul.f32 %v4148_v2, %v3302_v20 }
 0x670   :  { %v1478_v54 = vpop.f32.mrf.mxu3 }
 0x671   :  { %v3574_v16 = vadd.f32 %v3508_v12, %v1478_v54 }
 0x673   :  { %v4150_v38 = vmax.f32 %v3574_v16, 0.0 }
 0x675   :  { %v1518_v48 = vmul.f32 %v4150_v38, %v3311_v30 }
 0x678   :  { %v1481_v58 = vpop.f32.mrf.mxu3 }
 0x679   :  { %v3581_v36 = vadd.f32 %v3508_v12, %v1481_v58 }
 0x67b   :  { %v1503_v5 = vmax.f32 %v3581_v36, 0.0 }
 0x67d   :  { %v1519_v41 = vmul.f32 %v1503_v5, %v3327_v42 }
 0x680   :  { %v1483_v53 = vpop.f32.mrf.mxu3 }
 0x681   :  { %v3588_v54 = vadd.f32 %v3508_v12, %v1483_v53  ;;  %v1532_v53 = vadd.f32 %v1531_v10, %v1517_v24 }
 0x683   :  { %v1504_v23 = vmax.f32 %v3588_v54, 0.0  ;;  %v1533_v15 = vadd.f32 %v1532_v53, %v1518_v48 }
 0x685   :  { %v1520_v2 = vmul.f32 %v1504_v23, %v3337_v11  ;;  %v1534_v36 = vadd.f32 %v1533_v15, %v1519_v41  ;;  %v4211_v41 = vmax.f32 %v3511_v32, 0.0 }
 0x687   :  { %v1535_v17 = vadd.f32 %v1534_v36, %v1520_v2 }
 0x688   :  { %v1486_v40 = vpop.f32.mrf.mxu3 }
 0x689   :  { %v3595_v58 = vadd.f32 %v3508_v12, %v1486_v40 }
 0x68b   :  { %v4156_v61 = vmax.f32 %v3595_v58, 0.0 }
 0x68d   :  { %v1521_v6 = vmul.f32 %v4156_v61, %v3342_v31  ;;  %v4212_v61 = vmax.f32 %v3515_v60, 0.0 }
 0x68f   :  { %v1536_v59 = vadd.f32 %v1535_v17, %v1521_v6 }
 0x690   :  { %v1488_v62 = vpop.f32.mrf.mxu3 }
 0x691   :  { %v1489_v40 = vadd.f32 %v3508_v12, %v1488_v62  ;;  %v4213_v62 = vmax.f32 %v3525_v56, 0.0 }
 0x693   :  { %v1506_v38 = vmax.f32 %v1489_v40, 0.0 }
 0x695   :  { %v1522_v24 = vmul.f32 %v1506_v38, %v3351_v35 }
 0x697   :  { %v1537_v54 = vadd.f32 %v1536_v59, %v1522_v24  ;;  %v4214_v59 = vmax.f32 %v3532_v37, 0.0 }
 0x699   :  { %v1538_v10 = vrot.slane %v1537_v54, 4 }
 0x69b   :  { %v1539_v43 = vadd.f32 %v1538_v10, %v1537_v54  ;;  %v4216_v54 = vmax.f32 %v3553_v0, 0.0 }
 0x69d   :  { %v1540_v33 = vrot.slane %v1539_v43, 2 }
 0x69f   :  { %v1541_v48 = vadd.f32 %v1540_v33, %v1539_v43  ;;  %v4215_v33 = vmax.f32 %v3539_v9, 0.0 }
 0x6a1   :  { %v1542_v53 = vrot.slane %v1541_v48, 1 }
 0x6a3   :  { %v1543_v51 = vadd.f32 %v1542_v53, %v1541_v48 }
 0x6a5   :  { %v1544_v4 = vmul.f32 0.0625, %v1543_v51 }
 0x6a7   :  { %v3611_v15 = vsub.f32 %v4211_v41, %v1544_v4  ;;  %v3615_v12 = vsub.f32 %v4212_v61, %v1544_v4  ;;  %v3619_v2 = vsub.f32 %v4213_v62, %v1544_v4  ;;  %v3623_v36 = vsub.f32 %v4214_v59, %v1544_v4 }
 0x6a8   :  { %v3627_v43 = vsub.f32 %v4215_v33, %v1544_v4  ;;  %v3635_v6 = vsub.f32 %v1496_v28, %v1544_v4  ;;  %v3639_v40 = vsub.f32 %v1497_v63, %v1544_v4  ;;  %v3645_v10 = vsub.f32 %v4216_v54, %v1544_v4 }
 0x6a9   :  { %v1561_v51 = vmul.f32 %v3611_v15, %v3207_v8  ;;  %v1562_v32 = vmul.f32 %v3615_v12, %v3221_v14  ;;  %v1563_v60 = vmul.f32 %v3619_v2, %v3230_v19  ;;  %v1564_v37 = vmul.f32 %v3623_v36, %v3243_v29 }
 0x6aa   :  { %v1565_v9 = vmul.f32 %v3627_v43, %v3251_v25  ;;  %v1566_v48 = vmul.f32 %v3635_v6, %v3257_v44  ;;  %v4217_v41 = vmax.f32 %v3557_v7, 0.0  ;;  %v1567_v63 = vmul.f32 %v3639_v40, %v3262_v47 }
 0x6ab   :  { %v1577_v56 = vmul.f32 %v1561_v51, %v1561_v51  ;;  %v1578_v61 = vmul.f32 %v1562_v32, %v1562_v32  ;;  %v1579_v17 = vmul.f32 %v1563_v60, %v1563_v60  ;;  %v1580_v53 = vmul.f32 %v1564_v37, %v1564_v37 }
 0x6ac   :  { %v3651_v62 = vsub.f32 %v4217_v41, %v1544_v4  ;;  %v1581_v59 = vmul.f32 %v1565_v9, %v1565_v9  ;;  %v4218_v51 = vmax.f32 %v3562_v39, 0.0  ;;  %v1568_v0 = vmul.f32 %v3645_v10, %v3271_v52 }
 0x6ad   :  { %v1593_v24 = vadd.f32 %v1578_v61, %v1577_v56  ;;  %v1582_v60 = vmul.f32 %v1566_v48, %v1566_v48  ;;  %v4219_v61 = vmax.f32 %v3567_v49, 0.0  ;;  %v4220_v9 = vmax.f32 %v3574_v16, 0.0 }
 0x6ae   :  { %v3657_v32 = vsub.f32 %v4218_v51, %v1544_v4  ;;  %v1569_v7 = vmul.f32 %v3651_v62, %v3277_v55  ;;  %v3673_v48 = vsub.f32 %v1503_v5, %v1544_v4 }
 0x6af   :  { %v1594_v28 = vadd.f32 %v1593_v24, %v1579_v17  ;;  %v3663_v37 = vsub.f32 %v4219_v61, %v1544_v4  ;;  %v1583_v17 = vmul.f32 %v1567_v63, %v1567_v63  ;;  %v3669_v54 = vsub.f32 %v4220_v9, %v1544_v4 }
 0x6b0   :  { %v1570_v39 = vmul.f32 %v3657_v32, %v3286_v1  ;;  %v1585_v41 = vmul.f32 %v1569_v7, %v1569_v7 }
 0x6b1   :  { %v1595_v33 = vadd.f32 %v1594_v28, %v1580_v53  ;;  %v1584_v53 = vmul.f32 %v1568_v0, %v1568_v0  ;;  %v1571_v49 = vmul.f32 %v3663_v37, %v3302_v20  ;;  %v1572_v63 = vmul.f32 %v3669_v54, %v3311_v30 }
 0x6b2   :  { %v1586_v16 = vmul.f32 %v1570_v39, %v1570_v39  ;;  %v1573_v0 = vmul.f32 %v3673_v48, %v3327_v42 }
 0x6b3   :  { %v1596_v56 = vadd.f32 %v1595_v33, %v1581_v59  ;;  %v3677_v33 = vsub.f32 %v1504_v23, %v1544_v4  ;;  %v1587_v5 = vmul.f32 %v1571_v49, %v1571_v49 }
 0x6b5   :  { %v1597_v24 = vadd.f32 %v1596_v56, %v1582_v60  ;;  %v4221_v60 = vmax.f32 %v3595_v58, 0.0  ;;  %v1574_v7 = vmul.f32 %v3677_v33, %v3337_v11 }
 0x6b7   :  { %v1598_v28 = vadd.f32 %v1597_v24, %v1583_v17  ;;  %v1559_v56 = vsub.f32 %v4221_v60, %v1544_v4  ;;  %v1560_v17 = vsub.f32 %v1506_v38, %v1544_v4  ;;  %v1588_v24 = vmul.f32 %v1572_v63, %v1572_v63 }
 0x6b9   :  { %v1599_v59 = vadd.f32 %v1598_v28, %v1584_v53  ;;  %v1575_v9 = vmul.f32 %v1559_v56, %v3342_v31  ;;  %v1589_v53 = vmul.f32 %v1573_v0, %v1573_v0  ;;  %v1576_v39 = vmul.f32 %v1560_v17, %v3351_v35  ;;  %v4222_v35 = vld [vmem:[#allocation28_spill] sm:$0xff] }
 0x6bb   :  { %v1600_v51 = vadd.f32 %v1599_v59, %v1585_v41  ;;  %v1590_v41 = vmul.f32 %v1574_v7, %v1574_v7  ;;  %v1591_v59 = vmul.f32 %v1575_v9, %v1575_v9  ;;  %v1592_v30 = vmul.f32 %v1576_v39, %v1576_v39 }
 0x6bc   :  { %v1131_v7 = vstv %s1130_s6 }
 0x6bd   :  { %v1601_v61 = vadd.f32 %v1600_v51, %v1586_v16  ;;  %v3702_v39 = vmul.f32 %v1131_v7, %v3454_v13  ;;  %v2778_v13 = vld [vmem:[%s4127_s13 + $0x1] ss:$0 sm:$0xff] }
 0x6bf   :  { %v1602_v23 = vadd.f32 %v1601_v61, %v1587_v5 }
 0x6c1   :  { %v1603_v28 = vadd.f32 %v1602_v23, %v1588_v24 }
 0x6c3   :  { %v1604_v58 = vadd.f32 %v1603_v28, %v1589_v53  ;;  %v3699_v28 = vmul.f32 %v1131_v7, %v3450_v27  ;;  %v3717_v27 = vmul.f32 %v1131_v7, %v3470_v57 }
 0x6c5   :  { %v1605_v60 = vadd.f32 %v1604_v58, %v1590_v41  ;;  %v3705_v41 = vmul.f32 %v1131_v7, %v3456_v18  ;;  %v3723_v18 = vmul.f32 %v1131_v7, %v3476_v21 }
 0x6c7   :  { %v1606_v42 = vadd.f32 %v1605_v60, %v1591_v59 }
 0x6c9   :  { %v1607_v49 = vadd.f32 %v1606_v42, %v1592_v30  ;;  %v3690_v30 = vmul.f32 %v1131_v7, %v3438_v26  ;;  %v3693_v42 = vmul.f32 %v1131_v7, %v3440_v3  ;;  %v3708_v26 = vmul.f32 %v1131_v7, %v3442_v46 }
 0x6ca   :  { %v3711_v3 = vmul.f32 %v1131_v7, %v3444_v45  ;;  %v3726_v46 = vmul.f32 %v1131_v7, %v3478_v34  ;;  %v3728_v45 = vstv %s2584_s9 }
 0x6cb   :  { %v1608_v16 = vrot.slane %v1607_v49, 4 }
 0x6cd   :  { %v1609_v4 = vadd.f32 %v1608_v16, %v1607_v49 }
 0x6cf   :  { %v1610_v38 = vrot.slane %v1609_v4, 2 }
 0x6d1   :  { %v1611_v51 = vadd.f32 %v1610_v38, %v1609_v4 }
 0x6d3   :  { %v1612_v11 = vrot.slane %v1611_v51, 1 }
 0x6d5   :  { %v1613_v63 = vadd.f32 %v1612_v11, %v1611_v51  ;;  %v3696_v11 = vmul.f32 %v1131_v7, %v3448_v22  ;;  %v3714_v22 = vmul.f32 %v1131_v7, %v3468_v50  ;;  %v2779_v50 = vld [vmem:[%s4128_s14 + $0x1] ss:$0 sm:$0xff] }
 0x6d7   :  { %v1614_v5 = vmul.f32 0.0625, %v1613_v63 }
 0x6d9   :  { %v1615_v61 = vadd.f32 1e-05, %v1614_v5 }
 0x6db   :  { %2786 = vrsqrt.f32 %v1615_v61  ;;  %vm1622_vm4 = vweird.f32 %v1615_v61 }
 0x6e1   :  { %v2787_v0 = vpop.eup %2786 }
 0x6e2   :  { %v1617_v24 = vmul.f32 %v2787_v0, %v1615_v61  ;;  %vm1623_vm3 = vweird.f32 %v2787_v0 }
 0x6e3   :  { %vm1624_vm5 = vmor %vm1622_vm4, %vm1623_vm3 }
 0x6e4   :  { %v1618_v23 = vmul.f32 %v2787_v0, %v1617_v24 }
 0x6e6   :  { %v1619_v9 = vmul.f32 0.5, %v1618_v23 }
 0x6e8   :  { %v1620_v53 = vsub.f32 1.5, %v1619_v9 }
 0x6ea   :  { %v1621_v58 = vmul.f32 %v2787_v0, %v1620_v53 }
 0x6ec   :  { %v1625_v59 = vsel %vm1624_vm5, %v2787_v0, %v1621_v58 }
 0x6ed   :  { %v1641_v60 = vmul.f32 %v1625_v59, %v1560_v17  ;;  %v1640_v57 = vmul.f32 %v1625_v59, %v1559_v56  ;;  %v1638_v49 = vmul.f32 %v1625_v59, %v3673_v48  ;;  %v1639_v16 = vmul.f32 %v1625_v59, %v3677_v33 }
 0x6ee   :  { %v1636_v4 = vmul.f32 %v1625_v59, %v3663_v37  ;;  %v1637_v21 = vmul.f32 %v1625_v59, %v3669_v54  ;;  %v1634_v34 = vmul.f32 %v1625_v59, %v3651_v62  ;;  %v1635_v38 = vmul.f32 %v1625_v59, %v3657_v32  ;;  %v4223_v32 = vld [vmem:[#allocation29_spill] sm:$0xff] }
 0x6ef   :  { %v1662_v51 = vmul.f32 %v2778_v13, %v1641_v60  ;;  %v1661_v63 = vmul.f32 %v2778_v13, %v1640_v57  ;;  %v1659_v17 = vmul.f32 %v2778_v13, %v1638_v49  ;;  %v1660_v5 = vmul.f32 %v2778_v13, %v1639_v16  ;;  %v4224_v57 = vld [vmem:[#allocation30_spill] sm:$0xff] }
 0x6f0   :  { %v1657_v61 = vmul.f32 %v2778_v13, %v1636_v4  ;;  %v1658_v0 = vmul.f32 %v2778_v13, %v1637_v21  ;;  %v1655_v24 = vmul.f32 %v2778_v13, %v1634_v34  ;;  %v1656_v56 = vmul.f32 %v2778_v13, %v1635_v38  ;;  %v4225_v4 = vld [vmem:[#allocation31_spill] sm:$0xff] }
 0x6f1   :  { %v1683_v23 = vadd.f32 %v2779_v50, %v1662_v51  ;;  %v1682_v48 = vadd.f32 %v2779_v50, %v1661_v63  ;;  %v1680_v9 = vadd.f32 %v2779_v50, %v1659_v17  ;;  %v1681_v33 = vadd.f32 %v2779_v50, %v1660_v5 }
 0x6f2   :  { %v1678_v53 = vadd.f32 %v2779_v50, %v1657_v61  ;;  %v1679_v37 = vadd.f32 %v2779_v50, %v1658_v0  ;;  %v1676_v58 = vadd.f32 %v2779_v50, %v1655_v24  ;;  %v1677_v54 = vadd.f32 %v2779_v50, %v1656_v56 }
 0x6f3   :  { %v3740_v62 = vmul.f32 %v1131_v7, %v4222_v35  ;;  %v3743_v60 = vmul.f32 %v1131_v7, %v4223_v32  ;;  %v3746_v49 = vmul.f32 %v1131_v7, %v4224_v57  ;;  %v1725_v16 = vpack.c.bf16 %v1683_v23, %v1682_v48 }
 0x6f4   :  { %v3749_v21 = vmul.f32 %v1131_v7, %v4225_v4  ;;  %v1701_v34 = vmul.f32 %v3728_v45, %v1683_v23  ;;  %v1700_v38 = vmul.f32 %v3728_v45, %v1682_v48  ;;  %v1698_v51 = vmul.f32 %v3728_v45, %v1680_v9 }
 0x6f5   :  { %1726 = vmatpush.bf16.msra.mxu0 %v1725_v16  ;;  %v1699_v35 = vmul.f32 %v3728_v45, %v1681_v33  ;;  %v1724_v63 = vpack.c.bf16 %v1681_v33, %v1680_v9  ;;  %v1723_v17 = vpack.c.bf16 %v1679_v37, %v1678_v53  ;;  %v1722_v5 = vpack.c.bf16 %v1677_v54, %v1676_v58 }
 0x6f6   :  { %v1632_v61 = vmul.f32 %v1625_v59, %v3639_v40  ;;  %v1633_v0 = vmul.f32 %v1625_v59, %v3645_v10  ;;  %v1630_v24 = vmul.f32 %v1625_v59, %v3627_v43  ;;  %v1631_v7 = vmul.f32 %v1625_v59, %v3635_v6 }
 0x6f7   :  { %v1628_v56 = vmul.f32 %v1625_v59, %v3619_v2  ;;  %v1629_v23 = vmul.f32 %v1625_v59, %v3623_v36  ;;  %v1626_v48 = vmul.f32 %v1625_v59, %v3611_v15  ;;  %v1627_v32 = vmul.f32 %v1625_v59, %v3615_v12 }
 0x6f8   :  { %v1653_v57 = vmul.f32 %v2778_v13, %v1632_v61  ;;  %v1654_v9 = vmul.f32 %v2778_v13, %v1633_v0  ;;  %v1651_v33 = vmul.f32 %v2778_v13, %v1630_v24  ;;  %v1652_v16 = vmul.f32 %v2778_v13, %v1631_v7 }
 0x6f9   :  { %1727 = vmatpush.bf16.msra.mxu0 %v1724_v63  ;;  %v1649_v40 = vmul.f32 %v2778_v13, %v1628_v56  ;;  %v1650_v4 = vmul.f32 %v2778_v13, %v1629_v23  ;;  %v1647_v10 = vmul.f32 %v2778_v13, %v1626_v48  ;;  %v1648_v31 = vmul.f32 %v2778_v13, %v1627_v32  ;;  %v2719_v48 = vld [vmem:[#allocation9 + $0x88] sm:$0xff]  ;;  %v2796_v32 = vld [vmem:[%s4189_s15 + $0x30] sm:$0xff] }
 0x6fa   :  { %v1674_v43 = vadd.f32 %v2779_v50, %v1653_v57  ;;  %v1675_v20 = vadd.f32 %v2779_v50, %v1654_v9  ;;  %v1672_v6 = vadd.f32 %v2779_v50, %v1651_v33  ;;  %v1673_v1 = vadd.f32 %v2779_v50, %v1652_v16  ;;  %v2718_v57 = vld [vmem:[#allocation9 + $0x80] sm:$0xff]  ;;  %v2797_v9 = vld [vmem:[%s4189_s15 + $0x38] sm:$0xff] }
 0x6fb   :  { %v1670_v2 = vadd.f32 %v2779_v50, %v1649_v40  ;;  %v1671_v55 = vadd.f32 %v2779_v50, %v1650_v4  ;;  %v1668_v36 = vadd.f32 %v2779_v50, %v1647_v10  ;;  %v1669_v52 = vadd.f32 %v2779_v50, %v1648_v31 }
 0x6fc   :  { %v1696_v15 = vmul.f32 %v3728_v45, %v1678_v53  ;;  %v1697_v12 = vmul.f32 %v3728_v45, %v1679_v37  ;;  %v1694_v59 = vmul.f32 %v3728_v45, %v1676_v58  ;;  %v1695_v63 = vmul.f32 %v3728_v45, %v1677_v54 }
 0x6fd   :  { %1728 = vmatpush.bf16.msra.mxu0 %v1723_v17  ;;  %v1692_v61 = vmul.f32 %v3728_v45, %v1674_v43  ;;  %v1693_v13 = vmul.f32 %v3728_v45, %v1675_v20  ;;  %v1690_v0 = vmul.f32 %v3728_v45, %v1672_v6  ;;  %v1691_v24 = vmul.f32 %v3728_v45, %v1673_v1 }
 0x6fe   :  { %v1688_v7 = vmul.f32 %v3728_v45, %v1670_v2  ;;  %v1689_v31 = vmul.f32 %v3728_v45, %v1671_v55  ;;  %v1686_v50 = vmul.f32 %v3728_v45, %v1668_v36  ;;  %v1687_v53 = vmul.f32 %v3728_v45, %v1669_v52 }
 0x6ff   :  { %v3776_v37 = vadd.f32 %v1700_v38, %v3690_v30  ;;  %v3779_v58 = vadd.f32 %v1701_v34, %v3693_v42  ;;  %v3782_v54 = vadd.f32 %v1698_v51, %v3696_v11  ;;  %v3785_v17 = vadd.f32 %v1699_v35, %v3699_v28  ;;  %v2723_v38 = vld [vmem:[#allocation9 + $0xa8] sm:$0xff]  ;;  %v2722_v51 = vld [vmem:[#allocation9 + $0xa0] sm:$0xff]  ;;  %v2721_v35 = vld [vmem:[#allocation9 + $0x98] sm:$0xff] }
 0x700   :  { %v3788_v56 = vadd.f32 %v1696_v15, %v3702_v39  ;;  %v3791_v23 = vadd.f32 %v1697_v12, %v3705_v41  ;;  %v3794_v45 = vadd.f32 %v1694_v59, %v3708_v26  ;;  %v3797_v30 = vadd.f32 %v1695_v63, %v3711_v3 }
 0x701   :  { %1729 = vmatpush.bf16.msra.mxu0 %v1722_v5  ;;  %v3800_v42 = vadd.f32 %v1692_v61, %v3714_v22  ;;  %v3803_v11 = vadd.f32 %v1693_v13, %v3717_v27  ;;  %v3806_v28 = vadd.f32 %v1690_v0, %v3723_v18  ;;  %v3809_v39 = vadd.f32 %v1691_v24, %v3726_v46  ;;  %v2720_v5 = vld [vmem:[#allocation9 + $0x90] sm:$0xff] }
 0x702   :  { %v3812_v41 = vadd.f32 %v1688_v7, %v3740_v62  ;;  %v3815_v26 = vadd.f32 %v1689_v31, %v3743_v60  ;;  %v3818_v3 = vadd.f32 %v1686_v50, %v3746_v49  ;;  %v3821_v22 = vadd.f32 %v1687_v53, %v3749_v21  ;;  %v2790_v62 = vld [vmem:[%s4189_s15] sm:$0xff]  ;;  %v2791_v60 = vld [vmem:[%s4189_s15 + $0x8] sm:$0xff]  ;;  %v2724_v49 = vld [vmem:[#allocation9 + $0xb0] sm:$0xff] }
 0x703   :  { %v1721_v27 = vpack.c.bf16 %v1675_v20, %v1674_v43  ;;  %v1720_v34 = vpack.c.bf16 %v1673_v1, %v1672_v6  ;;  %v1719_v18 = vpack.c.bf16 %v1671_v55, %v1670_v2  ;;  %v1718_v46 = vpack.c.bf16 %v1669_v52, %v1668_v36  ;;  %v2792_v20 = vld [vmem:[%s4189_s15 + $0x10] sm:$0xff]  ;;  %v2793_v52 = vld [vmem:[%s4189_s15 + $0x18] sm:$0xff]  ;;  %v2794_v55 = vld [vmem:[%s4189_s15 + $0x20] sm:$0xff] }
 0x704   :  { %4226 = vst [vmem:[#allocation28_spill] sm:$0xff] %v3812_v41  ;;  %v2725_v1 = vld [vmem:[#allocation9 + $0xb8] sm:$0xff]  ;;  %v2795_v21 = vld [vmem:[%s4189_s15 + $0x28] sm:$0xff]  ;;  %v2732_v50 = vld [vmem:[#allocation10 + $0xb0] sm:$0xff] }
 0x705   :  { %4227 = vst [vmem:[#allocation29_spill] sm:$0xff] %v3815_v26  ;;  %1730 = vmatpush.bf16.msra.mxu0 %v1721_v27  ;;  %2742 = vmatpush.bf16.msra.mxu1 %v2725_v1  ;;  %v2733_v31 = vld [vmem:[#allocation10 + $0xb8] sm:$0xff]  ;;  %v2731_v53 = vld [vmem:[#allocation10 + $0xa8] sm:$0xff] }
 0x706   :  { %4228 = vst [vmem:[#allocation30_spill] sm:$0xff] %v3818_v3  ;;  %2750 = vmatpush.bf16.msra.mxu2 %v2733_v31 }
 0x707   :  { %4229 = vst [vmem:[#allocation31_spill] sm:$0xff] %v3821_v22 }
 0x709   :  { %1731 = vmatpush.bf16.msra.mxu0 %v1720_v34  ;;  %2743 = vmatpush.bf16.msra.mxu1 %v2724_v49  ;;  %v2730_v34 = vld [vmem:[#allocation10 + $0xa0] sm:$0xff] }
 0x70a   :  { %2751 = vmatpush.bf16.msra.mxu2 %v2732_v50 }
 0x70d   :  { %1732 = vmatpush.bf16.msra.mxu0 %v1719_v18  ;;  %2744 = vmatpush.bf16.msra.mxu1 %v2723_v38 }
 0x70e   :  { %2752 = vmatpush.bf16.msra.mxu2 %v2731_v53 }
 0x711   :  { %1733 = vmatpush.bf16.msra.mxu0 %v1718_v46  ;;  %2745 = vmatpush.bf16.msra.mxu1 %v2722_v51 }
 0x712   :  { %2753 = vmatpush.bf16.msra.mxu2 %v2730_v34 }
 0x714   :  { %1734 = vmatmul.bf16.vlgmr.msra.gmra.mxu0 %v2790_v62  ;;  %v2729_v62 = vld [vmem:[#allocation10 + $0x98] sm:$0xff] }
 0x715   :  { %1853 = vmatpush.bf16.msrb.mxu0 %v2725_v1  ;;  %2746 = vmatpush.bf16.msra.mxu1 %v2721_v35 }
 0x716   :  { %2754 = vmatpush.bf16.msra.mxu2 %v2729_v62 }
 0x719   :  { %1854 = vmatpush.bf16.msrb.mxu0 %v2724_v49  ;;  %2747 = vmatpush.bf16.msra.mxu1 %v2720_v5 }
 0x71d   :  { %1855 = vmatpush.bf16.msrb.mxu0 %v2723_v38  ;;  %2748 = vmatpush.bf16.msra.mxu1 %v2719_v48  ;;  %v2780_v38 = vld [vmem:[%s4124_s10 + $0x2] ss:$0 sm:$0xff] }
 0x721   :  { %1856 = vmatpush.bf16.msrb.mxu0 %v2722_v51  ;;  %2749 = vmatpush.bf16.msra.mxu1 %v2718_v57 }
 0x724   :  { %1739 = vmatmul.bf16.gmra.mxu0 %v2791_v60  ;;  %v2728_v60 = vld [vmem:[#allocation10 + $0x90] sm:$0xff] }
 0x725   :  { %1857 = vmatpush.bf16.msrb.mxu0 %v2721_v35  ;;  %2755 = vmatpush.bf16.msra.mxu2 %v2728_v60 }
 0x729   :  { %1858 = vmatpush.bf16.msrb.mxu0 %v2720_v5 }
 0x72d   :  { %1859 = vmatpush.bf16.msrb.mxu0 %v2719_v48 }
 0x731   :  { %1860 = vmatpush.bf16.msrb.mxu0 %v2718_v57 }
 0x734   :  { %1744 = vmatmul.bf16.gmra.mxu0 %v2792_v20 }
 0x735   :  { %1996 = vmatpush.bf16.msra.mxu0 %v2733_v31 }
 0x739   :  { %1997 = vmatpush.bf16.msra.mxu0 %v2732_v50 }
 0x73d   :  { %1998 = vmatpush.bf16.msra.mxu0 %v2731_v53 }
 0x741   :  { %1999 = vmatpush.bf16.msra.mxu0 %v2730_v34 }
 0x744   :  { %1749 = vmatmul.bf16.gmra.mxu0 %v2793_v52  ;;  %v2727_v52 = vld [vmem:[#allocation10 + $0x88] sm:$0xff] }
 0x745   :  { %2000 = vmatpush.bf16.msra.mxu0 %v2729_v62  ;;  %2756 = vmatpush.bf16.msra.mxu2 %v2727_v52 }
 0x749   :  { %2001 = vmatpush.bf16.msra.mxu0 %v2728_v60 }
 0x74d   :  { %2002 = vmatpush.bf16.msra.mxu0 %v2727_v52 }
 0x754   :  { %1754 = vmatmul.bf16.gmra.mxu0 %v2794_v55  ;;  %v2726_v55 = vld [vmem:[#allocation10 + $0x80] sm:$0xff] }
 0x755   :  { %2003 = vmatpush.bf16.msra.mxu0 %v2726_v55  ;;  %2757 = vmatpush.bf16.msra.mxu2 %v2726_v55 }
 0x764   :  { %1759 = vmatmul.bf16.gmra.mxu0 %v2795_v21 }
 0x774   :  { %1764 = vmatmul.bf16.gmra.mxu0 %v2796_v32 }
 0x784   :  { %1769 = vmatmul.bf16.gmra.mxu0 %v2797_v9 }
 0x791   :  { %v1735_v33 = vpop.f32.mrf.mxu0 }
 0x799   :  { %v1737_v16 = vpop.f32.mrf.mxu0 }
 0x79a   :  { %v1775_v40 = vpack.c.bf16 %v1737_v16, %v1735_v33 }
 0x79c   :  { %1861 = vmatmul.bf16.vlgmr.msrb.gmra.mxu0 %v1775_v40 }
 0x7a1   :  { %v1740_v4 = vpop.f32.mrf.mxu0 }
 0x7a9   :  { %v1742_v10 = vpop.f32.mrf.mxu0 }
 0x7aa   :  { %v1776_v43 = vpack.c.bf16 %v1742_v10, %v1740_v4 }
 0x7ac   :  { %1866 = vmatmul.bf16.vlgmr.msra.gmra.mxu1 %v1776_v43 }
 0x7b1   :  { %v1745_v6 = vpop.f32.mrf.mxu0 }
 0x7b9   :  { %v1747_v2 = vpop.f32.mrf.mxu0 }
 0x7ba   :  { %v1777_v36 = vpack.c.bf16 %v1747_v2, %v1745_v6 }
 0x7bc   :  { %1871 = vmatmul.bf16.gmra.mxu1 %v1777_v36 }
 0x7c1   :  { %v1750_v15 = vpop.f32.mrf.mxu0 }
 0x7c9   :  { %v1752_v12 = vpop.f32.mrf.mxu0 }
 0x7ca   :  { %v1778_v59 = vpack.c.bf16 %v1752_v12, %v1750_v15 }
 0x7cc   :  { %1876 = vmatmul.bf16.gmra.mxu1 %v1778_v59 }
 0x7d1   :  { %v1755_v63 = vpop.f32.mrf.mxu0 }
 0x7d9   :  { %v1757_v61 = vpop.f32.mrf.mxu0 }
 0x7da   :  { %v1779_v13 = vpack.c.bf16 %v1757_v61, %v1755_v63 }
 0x7dc   :  { %1881 = vmatmul.bf16.gmra.mxu1 %v1779_v13 }
 0x7e1   :  { %v1760_v0 = vpop.f32.mrf.mxu0 }
 0x7e9   :  { %v1762_v24 = vpop.f32.mrf.mxu0 }
 0x7ea   :  { %v1780_v7 = vpack.c.bf16 %v1762_v24, %v1760_v0 }
 0x7ec   :  { %1886 = vmatmul.bf16.gmra.mxu1 %v1780_v7 }
 0x7f1   :  { %v1765_v27 = vpop.f32.mrf.mxu0 }
 0x7f9   :  { %v1767_v18 = vpop.f32.mrf.mxu0 }
 0x7fa   :  { %v1781_v46 = vpack.c.bf16 %v1767_v18, %v1765_v27 }
 0x7fc   :  { %1891 = vmatmul.bf16.gmra.mxu1 %v1781_v46 }
 0x801   :  { %v1770_v20 = vpop.f32.mrf.mxu0 }
 0x809   :  { %v1772_v1 = vpop.f32.mrf.mxu0 }
 0x80a   :  { %v1782_v49 = vpack.c.bf16 %v1772_v1, %v1770_v20 }
 0x80c   :  { %1896 = vmatmul.bf16.gmra.mxu1 %v1782_v49 }
 0x819   :  { %v1862_v21 = vpop.f32.mrf.mxu0 }
 0x81a   :  { %v1863_v51 = vadd.f32 %v2780_v38, %v1862_v21 }
 0x81c   :  { %v1902_v48 = vmax.f32 %v1863_v51, 0.0 }
 0x821   :  { %v1864_v35 = vpop.f32.mrf.mxu0 }
 0x822   :  { %v1865_v5 = vadd.f32 %v2780_v38, %v1864_v35 }
 0x824   :  { %v1903_v32 = vmax.f32 %v1865_v5, 0.0 }
 0x826   :  { %v1918_v57 = vpack.c.bf16 %v1903_v32, %v1902_v48 }
 0x828   :  { %2004 = vmatmul.bf16.vlgmr.msra.gmra.mxu0 %v1918_v57 }
 0x829   :  { %v1867_v9 = vpop.f32.mrf.mxu1 }
 0x82a   :  { %v1868_v33 = vadd.f32 %v2780_v38, %v1867_v9 }
 0x82c   :  { %v1904_v4 = vmax.f32 %v1868_v33, 0.0 }
 0x831   :  { %v1869_v16 = vpop.f32.mrf.mxu1 }
 0x832   :  { %v1870_v40 = vadd.f32 %v2780_v38, %v1869_v16 }
 0x834   :  { %v1905_v10 = vmax.f32 %v1870_v40, 0.0 }
 0x836   :  { %v1919_v43 = vpack.c.bf16 %v1905_v10, %v1904_v4 }
 0x838   :  { %2009 = vmatmul.bf16.vlgmr.msra.gmra.mxu2 %v1919_v43 }
 0x839   :  { %v1872_v6 = vpop.f32.mrf.mxu1 }
 0x83a   :  { %v1873_v2 = vadd.f32 %v2780_v38, %v1872_v6 }
 0x83c   :  { %v1906_v12 = vmax.f32 %v1873_v2, 0.0 }
 0x841   :  { %v1874_v36 = vpop.f32.mrf.mxu1 }
 0x842   :  { %v1875_v15 = vadd.f32 %v2780_v38, %v1874_v36 }
 0x844   :  { %v1907_v59 = vmax.f32 %v1875_v15, 0.0 }
 0x846   :  { %v1920_v63 = vpack.c.bf16 %v1907_v59, %v1906_v12  ;;  %v3853_v12 = vld [vmem:[%s4126_s12 + $0x2] ss:$0 sm:$0xff]  ;;  %s2653_s12 = sld [smem:[#allocation12 + $0x2]] }
 0x848   :  { %2014 = vmatmul.bf16.gmra.mxu2 %v1920_v63 }
 0x849   :  { %v1877_v61 = vpop.f32.mrf.mxu1 }
 0x84a   :  { %v1878_v13 = vadd.f32 %v2780_v38, %v1877_v61 }
 0x84c   :  { %v1908_v7 = vmax.f32 %v1878_v13, 0.0 }
 0x851   :  { %v1879_v0 = vpop.f32.mrf.mxu1 }
 0x852   :  { %v1880_v24 = vadd.f32 %v2780_v38, %v1879_v0 }
 0x854   :  { %v1909_v31 = vmax.f32 %v1880_v24, 0.0 }
 0x856   :  { %v1921_v50 = vpack.c.bf16 %v1909_v31, %v1908_v7 }
 0x858   :  { %2019 = vmatmul.bf16.gmra.mxu2 %v1921_v50 }
 0x859   :  { %v1882_v53 = vpop.f32.mrf.mxu1 }
 0x85a   :  { %v1883_v27 = vadd.f32 %v2780_v38, %v1882_v53 }
 0x85c   :  { %v1910_v46 = vmax.f32 %v1883_v27, 0.0 }
 0x861   :  { %v1884_v34 = vpop.f32.mrf.mxu1 }
 0x862   :  { %v1885_v18 = vadd.f32 %v2780_v38, %v1884_v34 }
 0x864   :  { %v1911_v62 = vmax.f32 %v1885_v18, 0.0 }
 0x866   :  { %v1922_v60 = vpack.c.bf16 %v1911_v62, %v1910_v46 }
 0x868   :  { %2024 = vmatmul.bf16.gmra.mxu2 %v1922_v60 }
 0x869   :  { %v1887_v20 = vpop.f32.mrf.mxu1 }
 0x86a   :  { %v1888_v52 = vadd.f32 %v2780_v38, %v1887_v20 }
 0x86c   :  { %v1912_v49 = vmax.f32 %v1888_v52, 0.0 }
 0x871   :  { %v1889_v55 = vpop.f32.mrf.mxu1 }
 0x872   :  { %v1890_v1 = vadd.f32 %v2780_v38, %v1889_v55 }
 0x874   :  { %v1913_v21 = vmax.f32 %v1890_v1, 0.0 }
 0x876   :  { %v1923_v51 = vpack.c.bf16 %v1913_v21, %v1912_v49 }
 0x878   :  { %2029 = vmatmul.bf16.gmra.mxu2 %v1923_v51 }
 0x879   :  { %v1892_v35 = vpop.f32.mrf.mxu1 }
 0x87a   :  { %v1893_v5 = vadd.f32 %v2780_v38, %v1892_v35 }
 0x87c   :  { %v1914_v57 = vmax.f32 %v1893_v5, 0.0 }
 0x881   :  { %v1894_v48 = vpop.f32.mrf.mxu1 }
 0x882   :  { %v1895_v32 = vadd.f32 %v2780_v38, %v1894_v48 }
 0x884   :  { %v1915_v9 = vmax.f32 %v1895_v32, 0.0 }
 0x886   :  { %v1924_v33 = vpack.c.bf16 %v1915_v9, %v1914_v57 }
 0x888   :  { %2034 = vmatmul.bf16.gmra.mxu2 %v1924_v33 }
 0x889   :  { %v1897_v16 = vpop.f32.mrf.mxu1 }
 0x88a   :  { %v1898_v40 = vadd.f32 %v2780_v38, %v1897_v16 }
 0x88c   :  { %v1916_v43 = vmax.f32 %v1898_v40, 0.0 }
 0x891   :  { %v1899_v4 = vpop.f32.mrf.mxu1 }
 0x892   :  { %v1900_v10 = vadd.f32 %v2780_v38, %v1899_v4 }
 0x894   :  { %v1917_v6 = vmax.f32 %v1900_v10, 0.0 }
 0x896   :  { %v1925_v2 = vpack.c.bf16 %v1917_v6, %v1916_v43 }
 0x898   :  { %2039 = vmatmul.bf16.gmra.mxu2 %v1925_v2 }
 0x8a5   :  { %v2005_v36 = vpop.f32.mrf.mxu0 }
 0x8a6   :  { %v3859_v61 = vadd.f32 %v3853_v12, %v2005_v36 }
 0x8a8   :  { %v4184_v0 = vmax.f32 %v3859_v61, 0.0 }
 0x8aa   :  { %v2061_v50 = vmul.f32 %v4184_v0, %v3207_v8 }
 0x8ad   :  { %v2007_v15 = vpop.f32.mrf.mxu0 }
 0x8ae   :  { %v3856_v59 = vadd.f32 %v3853_v12, %v2007_v15 }
 0x8b0   :  { %v4183_v13 = vmax.f32 %v3856_v59, 0.0 }
 0x8b2   :  { %v2062_v7 = vmul.f32 %v4183_v13, %v3221_v14 }
 0x8b4   :  { %v2077_v34 = vadd.f32 %v2062_v7, %v2061_v50 }
 0x8bb   :  { %v2010_v63 = vpop.f32.mrf.mxu2 }
 0x8bc   :  { %v3862_v38 = vadd.f32 %v3853_v12, %v2010_v63 }
 0x8be   :  { %v4181_v24 = vmax.f32 %v3862_v38, 0.0 }
 0x8c0   :  { %v2063_v53 = vmul.f32 %v4181_v24, %v3230_v19  ;;  %v4237_v24 = vld [vmem:[#allocation26_spill] sm:$0xff] }
 0x8c2   :  { %v2078_v46 = vadd.f32 %v2077_v34, %v2063_v53  ;;  %v4230_v53 = vld [vmem:[#allocation19_spill] sm:$0xff] }
 0x8c3   :  { %v2012_v31 = vpop.f32.mrf.mxu2 }
 0x8c4   :  { %v3877_v27 = vadd.f32 %v3853_v12, %v2012_v31 }
 0x8c6   :  { %v4180_v18 = vmax.f32 %v3877_v27, 0.0 }
 0x8c8   :  { %v2064_v62 = vmul.f32 %v4180_v18, %v3243_v29 }
 0x8ca   :  { %v2079_v60 = vadd.f32 %v2078_v46, %v2064_v62 }
 0x8cb   :  { %v2015_v20 = vpop.f32.mrf.mxu2 }
 0x8cc   :  { %v3884_v52 = vadd.f32 %v3853_v12, %v2015_v20  ;;  %v4231_v20 = vld [vmem:[#allocation20_spill] sm:$0xff] }
 0x8ce   :  { %v4178_v55 = vmax.f32 %v3884_v52, 0.0 }
 0x8d0   :  { %v2065_v1 = vmul.f32 %v4178_v55, %v3251_v25  ;;  %v4236_v55 = vld [vmem:[#allocation25_spill] sm:$0xff] }
 0x8d2   :  { %v2080_v49 = vadd.f32 %v2079_v60, %v2065_v1 }
 0x8d3   :  { %v2017_v21 = vpop.f32.mrf.mxu2 }
 0x8d4   :  { %v3891_v9 = vadd.f32 %v3853_v12, %v2017_v21 }
 0x8d6   :  { %v2050_v40 = vmax.f32 %v3891_v9, 0.0 }
 0x8d8   :  { %v2066_v6 = vmul.f32 %v2050_v40, %v3257_v44 }
 0x8da   :  { %v2081_v50 = vadd.f32 %v2080_v49, %v2066_v6 }
 0x8db   :  { %v2020_v51 = vpop.f32.mrf.mxu2 }
 0x8dc   :  { %v3894_v16 = vadd.f32 %v3853_v12, %v2020_v51 }
 0x8de   :  { %v2051_v10 = vmax.f32 %v3894_v16, 0.0  ;;  %v4233_v16 = vld [vmem:[#allocation22_spill] sm:$0xff] }
 0x8e0   :  { %v2067_v63 = vmul.f32 %v2051_v10, %v3262_v47 }
 0x8e2   :  { %v2082_v60 = vadd.f32 %v2081_v50, %v2067_v63 }
 0x8e3   :  { %v2022_v35 = vpop.f32.mrf.mxu2 }
 0x8e4   :  { %v3898_v4 = vadd.f32 %v3853_v12, %v2022_v35  ;;  %v4232_v35 = vld [vmem:[#allocation21_spill] sm:$0xff] }
 0x8e6   :  { %v4177_v2 = vmax.f32 %v3898_v4, 0.0 }
 0x8e8   :  { %v2068_v34 = vmul.f32 %v4177_v2, %v4230_v53 }
 0x8ea   :  { %v2083_v49 = vadd.f32 %v2082_v60, %v2068_v34  ;;  %v4234_v34 = vld [vmem:[#allocation23_spill] sm:$0xff] }
 0x8eb   :  { %v2025_v5 = vpop.f32.mrf.mxu2 }
 0x8ec   :  { %v3902_v43 = vadd.f32 %v3853_v12, %v2025_v5 }
 0x8ee   :  { %v4176_v7 = vmax.f32 %v3902_v43, 0.0 }
 0x8f0   :  { %v2069_v1 = vmul.f32 %v4176_v7, %v4231_v20  ;;  %v4235_v7 = vld [vmem:[#allocation24_spill] sm:$0xff] }
 0x8f2   :  { %v2084_v9 = vadd.f32 %v2083_v49, %v2069_v1 }
 0x8f3   :  { %v2027_v48 = vpop.f32.mrf.mxu2 }
 0x8f4   :  { %v3907_v36 = vadd.f32 %v3853_v12, %v2027_v48 }
 0x8f6   :  { %v4175_v46 = vmax.f32 %v3907_v36, 0.0 }
 0x8f8   :  { %v2070_v5 = vmul.f32 %v4175_v46, %v4232_v35 }
 0x8fa   :  { %v2085_v50 = vadd.f32 %v2084_v9, %v2070_v5 }
 0x8fb   :  { %v2030_v32 = vpop.f32.mrf.mxu2 }
 0x8fc   :  { %v3912_v31 = vadd.f32 %v3853_v12, %v2030_v32 }
 0x8fe   :  { %v4179_v21 = vmax.f32 %v3912_v31, 0.0 }
 0x900   :  { %v2071_v6 = vmul.f32 %v4179_v21, %v4233_v16 }
 0x903   :  { %v2032_v57 = vpop.f32.mrf.mxu2 }
 0x904   :  { %v3919_v62 = vadd.f32 %v3853_v12, %v2032_v57 }
 0x906   :  { %v4182_v48 = vmax.f32 %v3919_v62, 0.0 }
 0x908   :  { %v2072_v60 = vmul.f32 %v4182_v48, %v4234_v34 }
 0x90b   :  { %v2035_v33 = vpop.f32.mrf.mxu2 }
 0x90c   :  { %v3926_v51 = vadd.f32 %v3853_v12, %v2035_v33 }
 0x90e   :  { %v2057_v63 = vmax.f32 %v3926_v51, 0.0 }
 0x910   :  { %v2073_v2 = vmul.f32 %v2057_v63, %v4235_v7 }
 0x913   :  { %v2037_v15 = vpop.f32.mrf.mxu2 }
 0x914   :  { %v3933_v32 = vadd.f32 %v3853_v12, %v2037_v15  ;;  %v2086_v15 = vadd.f32 %v2085_v50, %v2071_v6 }
 0x916   :  { %v2058_v46 = vmax.f32 %v3933_v32, 0.0  ;;  %v2087_v49 = vadd.f32 %v2086_v15, %v2072_v60  ;;  %v4238_v32 = vld [vmem:[#allocation27_spill] sm:$0xff] }
 0x918   :  { %v2074_v21 = vmul.f32 %v2058_v46, %v4236_v55  ;;  %v2088_v51 = vadd.f32 %v2087_v49, %v2073_v2  ;;  %v4239_v2 = vmax.f32 %v3859_v61, 0.0 }
 0x91a   :  { %v2089_v9 = vadd.f32 %v2088_v51, %v2074_v21 }
 0x91b   :  { %v2040_v57 = vpop.f32.mrf.mxu2 }
 0x91c   :  { %v3940_v33 = vadd.f32 %v3853_v12, %v2040_v57 }
 0x91e   :  { %v4185_v1 = vmax.f32 %v3940_v33, 0.0 }
 0x920   :  { %v2075_v5 = vmul.f32 %v4185_v1, %v4237_v24  ;;  %v4240_v1 = vmax.f32 %v3856_v59, 0.0 }
 0x922   :  { %v2090_v13 = vadd.f32 %v2089_v9, %v2075_v5  ;;  %v4244_v9 = vmax.f32 %v3898_v4, 0.0 }
 0x923   :  { %v2042_v18 = vpop.f32.mrf.mxu2 }
 0x924   :  { %v2043_v57 = vadd.f32 %v3853_v12, %v2042_v18  ;;  %v4241_v18 = vmax.f32 %v3862_v38, 0.0 }
 0x926   :  { %v2060_v48 = vmax.f32 %v2043_v57, 0.0 }
 0x928   :  { %v2076_v6 = vmul.f32 %v2060_v48, %v4238_v32 }
 0x92a   :  { %v2091_v50 = vadd.f32 %v2090_v13, %v2076_v6  ;;  %v4242_v13 = vmax.f32 %v3877_v27, 0.0 }
 0x92c   :  { %v2092_v0 = vrot.slane %v2091_v50, 4 }
 0x92e   :  { %v2093_v22 = vadd.f32 %v2092_v0, %v2091_v50  ;;  %v4245_v50 = vmax.f32 %v3902_v43, 0.0 }
 0x930   :  { %v2094_v3 = vrot.slane %v2093_v22, 2 }
 0x932   :  { %v2095_v60 = vadd.f32 %v2094_v3, %v2093_v22  ;;  %v4243_v3 = vmax.f32 %v3884_v52, 0.0 }
 0x934   :  { %v2096_v15 = vrot.slane %v2095_v60, 1 }
 0x936   :  { %v2097_v26 = vadd.f32 %v2096_v15, %v2095_v60  ;;  %v4246_v15 = vmax.f32 %v3907_v36, 0.0 }
 0x938   :  { %v2098_v41 = vmul.f32 0.0625, %v2097_v26 }
 0x93a   :  { %v3956_v49 = vsub.f32 %v4239_v2, %v2098_v41  ;;  %v3960_v12 = vsub.f32 %v4240_v1, %v2098_v41  ;;  %v3964_v21 = vsub.f32 %v4241_v18, %v2098_v41  ;;  %v3968_v0 = vsub.f32 %v4242_v13, %v2098_v41 }
 0x93b   :  { %v3972_v22 = vsub.f32 %v4243_v3, %v2098_v41  ;;  %v3980_v51 = vsub.f32 %v2050_v40, %v2098_v41  ;;  %v3984_v5 = vsub.f32 %v2051_v10, %v2098_v41  ;;  %v3996_v60 = vsub.f32 %v4245_v50, %v2098_v41 }
 0x93c   :  { %v2115_v26 = vmul.f32 %v3956_v49, %v3207_v8  ;;  %v2116_v59 = vmul.f32 %v3960_v12, %v3221_v14  ;;  %v2117_v61 = vmul.f32 %v3964_v21, %v3230_v19  ;;  %v2118_v27 = vmul.f32 %v3968_v0, %v3243_v29 }
 0x93d   :  { %v2119_v52 = vmul.f32 %v3972_v22, %v3251_v25  ;;  %v3990_v14 = vsub.f32 %v4244_v9, %v2098_v41  ;;  %v2120_v19 = vmul.f32 %v3980_v51, %v3257_v44  ;;  %v2121_v29 = vmul.f32 %v3984_v5, %v3262_v47 }
 0x93e   :  { %v2131_v38 = vmul.f32 %v2115_v26, %v2115_v26  ;;  %v2132_v1 = vmul.f32 %v2116_v59, %v2116_v59  ;;  %v2133_v57 = vmul.f32 %v2117_v61, %v2117_v61  ;;  %v2134_v6 = vmul.f32 %v2118_v27, %v2118_v27 }
 0x93f   :  { %v2135_v10 = vmul.f32 %v2119_v52, %v2119_v52  ;;  %v4002_v2 = vsub.f32 %v4246_v15, %v2098_v41  ;;  %v2122_v4 = vmul.f32 %v3990_v14, %v4230_v53  ;;  %v2136_v18 = vmul.f32 %v2120_v19, %v2120_v19 }
 0x940   :  { %v2147_v8 = vadd.f32 %v2132_v1, %v2131_v38  ;;  %v4247_v13 = vmax.f32 %v3912_v31, 0.0  ;;  %v2123_v43 = vmul.f32 %v3996_v60, %v4231_v20  ;;  %v2137_v26 = vmul.f32 %v2121_v29, %v2121_v29 }
 0x941   :  { %v4248_v47 = vmax.f32 %v3919_v62, 0.0  ;;  %v2124_v36 = vmul.f32 %v4002_v2, %v4232_v35  ;;  %v2138_v38 = vmul.f32 %v2122_v4, %v2122_v4  ;;  %v2111_v27 = vsub.f32 %v2057_v63, %v2098_v41 }
 0x942   :  { %v2148_v40 = vadd.f32 %v2147_v8, %v2133_v57  ;;  %v2109_v3 = vsub.f32 %v4247_v13, %v2098_v41  ;;  %v2139_v52 = vmul.f32 %v2123_v43, %v2123_v43  ;;  %v2112_v31 = vsub.f32 %v2058_v46, %v2098_v41 }
 0x943   :  { %v2110_v61 = vsub.f32 %v4248_v47, %v2098_v41  ;;  %v2140_v9 = vmul.f32 %v2124_v36, %v2124_v36  ;;  %v4249_v19 = vmax.f32 %v3940_v33, 0.0  ;;  %v2127_v62 = vmul.f32 %v2111_v27, %v4235_v7 }
 0x944   :  { %v2149_v25 = vadd.f32 %v2148_v40, %v2134_v6  ;;  %v2125_v53 = vmul.f32 %v2109_v3, %v4233_v16  ;;  %v2114_v35 = vsub.f32 %v2060_v48, %v2098_v41  ;;  %v2128_v29 = vmul.f32 %v2112_v31, %v4236_v55 }
 0x945   :  { %v2126_v8 = vmul.f32 %v2110_v61, %v4234_v34  ;;  %v2113_v6 = vsub.f32 %v4249_v19, %v2098_v41 }
 0x946   :  { %v2150_v44 = vadd.f32 %v2149_v25, %v2135_v10  ;;  %v2141_v40 = vmul.f32 %v2125_v53, %v2125_v53  ;;  %v2143_v25 = vmul.f32 %v2127_v62, %v2127_v62  ;;  %v2130_v34 = vmul.f32 %v2114_v35, %v4238_v32  ;;  %v4032_v62 = vld [vmem:[%s4128_s14 + $0x2] ss:$0 sm:$0xff] }
 0x947   :  { %v2142_v63 = vmul.f32 %v2126_v8, %v2126_v8  ;;  %v2129_v16 = vmul.f32 %v2113_v6, %v4237_v24  ;;  %v2144_v15 = vmul.f32 %v2128_v29, %v2128_v29 }
 0x948   :  { %v2151_v59 = vadd.f32 %v2150_v44, %v2136_v18  ;;  %v2146_v44 = vmul.f32 %v2130_v34, %v2130_v34 }
 0x949   :  { %v2145_v18 = vmul.f32 %v2129_v16, %v2129_v16 }
 0x94a   :  { %v2152_v1 = vadd.f32 %v2151_v59, %v2137_v26 }
 0x94c   :  { %v2153_v57 = vadd.f32 %v2152_v1, %v2138_v38 }
 0x94e   :  { %v2154_v20 = vadd.f32 %v2153_v57, %v2139_v52  ;;  %v4025_v57 = vld [vmem:[%s4127_s13 + $0x2] ss:$0 sm:$0xff] }
 0x950   :  { %v2155_v50 = vadd.f32 %v2154_v20, %v2140_v9  ;;  %v4027_v9 = vstv %s2653_s12 }
 0x952   :  { %v2156_v10 = vadd.f32 %v2155_v50, %v2141_v40 }
 0x954   :  { %v2157_v46 = vadd.f32 %v2156_v10, %v2142_v63 }
 0x956   :  { %v2158_v4 = vadd.f32 %v2157_v46, %v2143_v25 }
 0x958   :  { %v2159_v33 = vadd.f32 %v2158_v4, %v2144_v15 }
 0x95a   :  { %v2160_v13 = vadd.f32 %v2159_v33, %v2145_v18 }
 0x95c   :  { %v2161_v7 = vadd.f32 %v2160_v13, %v2146_v44 }
 0x95e   :  { %v2162_v43 = vrot.slane %v2161_v7, 4 }
 0x960   :  { %v2163_v26 = vadd.f32 %v2162_v43, %v2161_v7 }
 0x962   :  { %v2164_v41 = vrot.slane %v2163_v26, 2 }
 0x964   :  { %v2165_v48 = vadd.f32 %v2164_v41, %v2163_v26 }
 0x966   :  { %v2166_v55 = vrot.slane %v2165_v48, 1 }
 0x968   :  { %v2167_v59 = vadd.f32 %v2166_v55, %v2165_v48 }
 0x96a   :  { %v2168_v47 = vmul.f32 0.0625, %v2167_v59 }
 0x96c   :  { %v2169_v36 = vadd.f32 1e-05, %v2168_v47 }
 0x96e   :  { %2788 = vrsqrt.f32 %v2169_v36  ;;  %vm2176_vm7 = vweird.f32 %v2169_v36 }
 0x974   :  { %v2789_v24 = vpop.eup %2788 }
 0x975   :  { %v2171_v38 = vmul.f32 %v2789_v24, %v2169_v36  ;;  %vm2177_vm6 = vweird.f32 %v2789_v24 }
 0x976   :  { %vm2178_vm8 = vmor %vm2176_vm7, %vm2177_vm6 }
 0x977   :  { %v2172_v1 = vmul.f32 %v2789_v24, %v2171_v38 }
 0x979   :  { %v2173_v32 = vmul.f32 0.5, %v2172_v1 }
 0x97b   :  { %v2174_v53 = vsub.f32 1.5, %v2173_v32 }
 0x97d   :  { %v2175_v52 = vmul.f32 %v2789_v24, %v2174_v53 }
 0x97f   :  { %v2179_v8 = vsel %vm2178_vm8, %v2789_v24, %v2175_v52 }
 0x980   :  { %v2194_v20 = vmul.f32 %v2179_v8, %v2113_v6  ;;  %v2195_v19 = vmul.f32 %v2179_v8, %v2114_v35  ;;  %v2192_v40 = vmul.f32 %v2179_v8, %v2111_v27  ;;  %v2193_v50 = vmul.f32 %v2179_v8, %v2112_v31 }
 0x981   :  { %v2190_v29 = vmul.f32 %v2179_v8, %v2109_v3  ;;  %v2191_v63 = vmul.f32 %v2179_v8, %v2110_v61  ;;  %v2188_v10 = vmul.f32 %v2179_v8, %v3996_v60  ;;  %v2189_v16 = vmul.f32 %v2179_v8, %v4002_v2 }
 0x982   :  { %v2216_v25 = vmul.f32 %v4025_v57, %v2195_v19  ;;  %v2215_v46 = vmul.f32 %v4025_v57, %v2194_v20  ;;  %v2213_v6 = vmul.f32 %v4025_v57, %v2192_v40  ;;  %v2214_v35 = vmul.f32 %v4025_v57, %v2193_v50 }
 0x983   :  { %v2211_v34 = vmul.f32 %v4025_v57, %v2190_v29  ;;  %v2212_v15 = vmul.f32 %v4025_v57, %v2191_v63  ;;  %v2209_v27 = vmul.f32 %v4025_v57, %v2188_v10  ;;  %v2210_v3 = vmul.f32 %v4025_v57, %v2189_v16 }
 0x984   :  { %v2237_v60 = vadd.f32 %v4032_v62, %v2216_v25  ;;  %v2236_v2 = vadd.f32 %v4032_v62, %v2215_v46  ;;  %v2234_v61 = vadd.f32 %v4032_v62, %v2213_v6  ;;  %v2235_v31 = vadd.f32 %v4032_v62, %v2214_v35 }
 0x985   :  { %v2232_v4 = vadd.f32 %v4032_v62, %v2211_v34  ;;  %v2233_v18 = vadd.f32 %v4032_v62, %v2212_v15  ;;  %v2230_v33 = vadd.f32 %v4032_v62, %v2209_v27  ;;  %v2231_v44 = vadd.f32 %v4032_v62, %v2210_v3 }
 0x986   :  { %v2255_v13 = vmul.f32 %v4027_v9, %v2237_v60  ;;  %v2254_v7 = vmul.f32 %v4027_v9, %v2236_v2  ;;  %v2252_v43 = vmul.f32 %v4027_v9, %v2234_v61  ;;  %v2253_v26 = vmul.f32 %v4027_v9, %v2235_v31 }
 0x987   :  { %v2250_v41 = vmul.f32 %v4027_v9, %v2232_v4  ;;  %v2251_v48 = vmul.f32 %v4027_v9, %v2233_v18  ;;  %v2248_v55 = vmul.f32 %v4027_v9, %v2230_v33  ;;  %v2249_v59 = vmul.f32 %v4027_v9, %v2231_v44  ;;  %v4250_v44 = vld [vmem:[#allocation28_spill] sm:$0xff] }
 0x988   :  { %v2270_v47 = vadd.f32 %v2254_v7, %v3776_v37  ;;  %v2271_v36 = vadd.f32 %v2255_v13, %v3779_v58  ;;  %v2268_v24 = vadd.f32 %v2252_v43, %v3782_v54  ;;  %v2269_v38 = vadd.f32 %v2253_v26, %v3785_v17  ;;  %v4251_v13 = vld [vmem:[#allocation29_spill] sm:$0xff]  ;;  %v4253_v26 = vld [vmem:[#allocation31_spill] sm:$0xff] }
 0x989   :  { %v2266_v1 = vadd.f32 %v2250_v41, %v3788_v56  ;;  %v2267_v32 = vadd.f32 %v2251_v48, %v3791_v23  ;;  %v2264_v53 = vadd.f32 %v2248_v55, %v3794_v45  ;;  %v2265_v52 = vadd.f32 %v2249_v59, %v3797_v30 }
 0x98a   :  { %v2280_v20 = vpack.c.bf16 %v2271_v36, %v2270_v47  ;;  %v2279_v19 = vpack.c.bf16 %v2269_v38, %v2268_v24  ;;  %v2186_v40 = vmul.f32 %v2179_v8, %v3984_v5  ;;  %v2187_v37 = vmul.f32 %v2179_v8, %v3990_v14 }
 0x98b   :  { %v2278_v50 = vpack.c.bf16 %v2267_v32, %v2266_v1  ;;  %v2277_v58 = vpack.c.bf16 %v2265_v52, %v2264_v53  ;;  %v2184_v54 = vmul.f32 %v2179_v8, %v3972_v22  ;;  %v2185_v17 = vmul.f32 %v2179_v8, %v3980_v51 }
 0x98c   :  { %2290 = vmatpush.bf16.msrb.mxu3 %v2280_v20  ;;  %v2207_v56 = vmul.f32 %v4025_v57, %v2186_v40  ;;  %v2208_v23 = vmul.f32 %v4025_v57, %v2187_v37  ;;  %v2182_v45 = vmul.f32 %v2179_v8, %v3964_v21  ;;  %v2183_v30 = vmul.f32 %v2179_v8, %v3968_v0 }
 0x98d   :  { %v2205_v29 = vmul.f32 %v4025_v57, %v2184_v54  ;;  %v2206_v5 = vmul.f32 %v4025_v57, %v2185_v17  ;;  %v2180_v14 = vmul.f32 %v2179_v8, %v3956_v49  ;;  %v2181_v63 = vmul.f32 %v2179_v8, %v3960_v12 }
 0x98e   :  { %v2228_v22 = vadd.f32 %v4032_v62, %v2207_v56  ;;  %v2229_v51 = vadd.f32 %v4032_v62, %v2208_v23  ;;  %v2203_v10 = vmul.f32 %v4025_v57, %v2182_v45  ;;  %v2204_v16 = vmul.f32 %v4025_v57, %v2183_v30 }
 0x98f   :  { %v2226_v21 = vadd.f32 %v4032_v62, %v2205_v29  ;;  %v2227_v0 = vadd.f32 %v4032_v62, %v2206_v5  ;;  %v2201_v25 = vmul.f32 %v4025_v57, %v2180_v14  ;;  %v2202_v46 = vmul.f32 %v4025_v57, %v2181_v63 }
 0x990   :  { %2291 = vmatpush.bf16.msrb.mxu3 %v2279_v19  ;;  %v2246_v49 = vmul.f32 %v4027_v9, %v2228_v22  ;;  %v2247_v12 = vmul.f32 %v4027_v9, %v2229_v51  ;;  %v2224_v8 = vadd.f32 %v4032_v62, %v2203_v10  ;;  %v2225_v6 = vadd.f32 %v4032_v62, %v2204_v16 }
 0x991   :  { %v2244_v35 = vmul.f32 %v4027_v9, %v2226_v21  ;;  %v2245_v34 = vmul.f32 %v4027_v9, %v2227_v0  ;;  %v2222_v15 = vadd.f32 %v4032_v62, %v2201_v25  ;;  %v2223_v27 = vadd.f32 %v4032_v62, %v2202_v46 }
 0x992   :  { %v2262_v3 = vadd.f32 %v2246_v49, %v3800_v42  ;;  %v2263_v57 = vadd.f32 %v2247_v12, %v3803_v11  ;;  %v2242_v60 = vmul.f32 %v4027_v9, %v2224_v8  ;;  %v2243_v2 = vmul.f32 %v4027_v9, %v2225_v6  ;;  %v4252_v11 = vld [vmem:[#allocation30_spill] sm:$0xff] }
 0x993   :  { %v2260_v61 = vadd.f32 %v2244_v35, %v3806_v28  ;;  %v2261_v31 = vadd.f32 %v2245_v34, %v3809_v39  ;;  %v2240_v4 = vmul.f32 %v4027_v9, %v2222_v15  ;;  %v2241_v18 = vmul.f32 %v4027_v9, %v2223_v27  ;;  %v2272_v28 = vld [vmem:[%s4116_s2] sm:$0xf]  ;;  %v2288_v39 = vpop.permute.xlu1 %2287 }
 0x994   :  { %2292 = vmatpush.bf16.msrb.mxu3 %v2278_v50  ;;  %v2276_v33 = vpack.c.bf16 %v2263_v57, %v2262_v3  ;;  %v2258_v62 = vadd.f32 %v2242_v60, %v4250_v44  ;;  %v2259_v42 = vadd.f32 %v2243_v2, %v4251_v13 }
 0x995   :  { %v2275_v7 = vpack.c.bf16 %v2261_v31, %v2260_v61  ;;  %v2256_v43 = vadd.f32 %v2240_v4, %v4252_v11  ;;  %v2257_v41 = vadd.f32 %v2241_v18, %v4253_v26 }
 0x996   :  { %v2274_v48 = vpack.c.bf16 %v2259_v42, %v2258_v62 }
 0x997   :  { %v2273_v55 = vpack.c.bf16 %v2257_v41, %v2256_v43 }
 0x998   :  { %2293 = vmatpush.bf16.msrb.mxu3 %v2277_v58 }
 0x99c   :  { %2294 = vmatpush.bf16.msrb.mxu3 %v2276_v33 }
 0x9a0   :  { %2295 = vmatpush.bf16.msrb.mxu3 %v2275_v7 }
 0x9a4   :  { %2296 = vmatpush.bf16.msrb.mxu3 %v2274_v48 }
 0x9a8   :  { %2297 = vmatpush.bf16.msrb.mxu3 %v2273_v55 }
 0x9ab   :  { %2298 = vmatmul.bf16.vlgmr.msrb.gmra.mxu3 %v2272_v28 }
 0xa2e   :  { %v2299_v9 = vpop.f32.mrf.mxu3 }
 0xa2f   :  { %v2300_v59 = vadd.f32 %v2299_v9, %v2288_v39 }
 0xa31   :  { %2303 = vst [vmem:[#allocation13] sm:$0xff] %v2300_v59 }
 0xa32   :  { %2314 = dma.vmem_to_hbm [thread:$0]  %s2310_s18, 128, %s2312_s21, [#allocation5]  }
 0xa36   :  { %v2301_v47 = vpop.f32.mrf.mxu3 }
 0xa37   :  { %2938 = dma.done.wait [#allocation5], 128  }
 0xa38   :  { %2939 = vsyncadd [#allocation5], 4294967168 }
 0xa39   :  { %2319 = vsyncpa [#allocation4], 1 }
 0xa3a   :  { %2320 = vsyncpa [#allocation8], 1 }
 0xa3b   :  { %2321 = vsyncpa [#allocation11], 1 }
 0xa3c   :  { %2322 = vsyncpa [#allocation5], 1 }
 0xa3d   :  { %2323 = vsyncpa [#allocation6], 1 }

</bundles_post_ra>
